<compile_context>
chip_gen: v6e
topology: v6e:2x2x1
jax: 0.10.0
libtpu: 0.0.40
codegen_flags: <defaults>
</compile_context>

<pallas_src>
import functools
import math

import jax
import jax.numpy as jnp
from jax import lax
from jax.experimental import pallas as pl
from jax.experimental.pallas import tpu as pltpu


_PARAM_ORDER = ("wq", "wk", "wv", "bq", "bk", "bv", "wo", "bo",
                "ln1_g", "ln1_b", "w1", "b1", "w2", "b2", "ln2_g", "ln2_b")
_MATMUL_WEIGHTS = ("wq", "wk", "wv", "wo", "w1", "w2")

# Tri-state: None = unknown, True/False = whether pl.Buffered(1) is usable.
_single_buffer_ok = None


def _layer_norm(x, g, b, eps=1e-5):
    # PyTorch LayerNorm: biased variance over last dim, eps inside sqrt.
    mu = jnp.mean(x, axis=-1, keepdims=True)
    var = jnp.mean(jnp.square(x - mu), axis=-1, keepdims=True)
    return (x - mu) * lax.rsqrt(var + eps) * g + b


# ----------------------------------------------------------------------------
# Kernel body: one encoder layer, one (batch, query-tile) grid step.
# ----------------------------------------------------------------------------
def encoder_layer_kernel(x_ref,
                         wq_ref, wk_ref, wv_ref, bq_ref, bk_ref, bv_ref,
                         wo_ref, bo_ref, ln1_g_ref, ln1_b_ref,
                         w1_ref, b1_ref, w2_ref, b2_ref,
                         ln2_g_ref, ln2_b_ref,
                         out_ref, k_scr, v_scr,
                         *, n_heads, tq, tk):
    t = pl.program_id(1)
    S, H = x_ref.shape                      # per-batch (S, H) activation slab
    dh = H // n_heads
    n_chunks = S // tk

    # --- K/V projection: once per batch element, cached in VMEM scratch -----
    @pl.when(t == 0)
    def _compute_kv():
        xb = x_ref[...].astype(jnp.bfloat16)
        k = jnp.dot(xb, wk_ref[...], preferred_element_type=jnp.float32) + bk_ref[...]
        v = jnp.dot(xb, wv_ref[...], preferred_element_type=jnp.float32) + bv_ref[...]
        k_scr[...] = k.astype(jnp.bfloat16)
        v_scr[...] = v.astype(jnp.bfloat16)

    # --- query block: sliced from the resident slab (no extra input DMA) ----
    q0 = pl.multiple_of(t * tq, tq)
    xq = x_ref[pl.ds(q0, tq), :]            # (TQ, H) f32 — also the residual
    q = jnp.dot(xq.astype(jnp.bfloat16), wq_ref[...],
                preferred_element_type=jnp.float32) + bq_ref[...]
    # 1/sqrt(dh) is pre-folded into wq/bq at parameter-prep time.
    qh = q.reshape(tq, n_heads, dh).astype(jnp.bfloat16)     # (TQ, nh, dh)

    # --- head-batched attention over cached K/V (flash-style chunks) --------
    def attend(kh, vh, m, l, acc):
        # kh/vh: (TK, nh, dh) bf16.  Batch dim = heads; no explicit k.T.
        s = jnp.einsum('qhd,khd->hqk', qh, kh,
                       preferred_element_type=jnp.float32)   # (nh, TQ, TK) f32
        m_new = jnp.maximum(m, jnp.max(s, axis=-1, keepdims=True))
        alpha = jnp.exp(m - m_new)
        p = jnp.exp(s - m_new)
        l_new = alpha * l + jnp.sum(p, axis=-1, keepdims=True)
        pv = jnp.einsum('hqk,khd->hqd', p.astype(jnp.bfloat16), vh,
                        preferred_element_type=jnp.float32)  # (nh, TQ, dh) f32
        return m_new, l_new, alpha * acc + pv

    m0 = jnp.full((n_heads, tq, 1), -1e30, jnp.float32)
    l0 = jnp.zeros((n_heads, tq, 1), jnp.float32)
    a0 = jnp.zeros((n_heads, tq, dh), jnp.float32)

    if n_chunks == 1:
        kh = k_scr[...].reshape(S, n_heads, dh)
        vh = v_scr[...].reshape(S, n_heads, dh)
        _, l, acc = attend(kh, vh, m0, l0, a0)
    else:
        def body(c, carry):
            c0 = pl.multiple_of(c * tk, tk)
            kh = k_scr[pl.ds(c0, tk), :].reshape(tk, n_heads, dh)
            vh = v_scr[pl.ds(c0, tk), :].reshape(tk, n_heads, dh)
            return attend(kh, vh, *carry)
        _, l, acc = lax.fori_loop(0, n_chunks, body, (m0, l0, a0))

    # flash-style: normalise AFTER the p@v matmul (fewer elements, EUP slot).
    # NOTE: approx reciprocal ~1e-3 rel. error; set approx=False for parity.
    ctx = acc * pl.reciprocal(l, approx=True)                # (nh, TQ, dh)
    attn = jnp.swapaxes(ctx, 0, 1).reshape(tq, H).astype(jnp.bfloat16)
    attn = jnp.dot(attn, wo_ref[...],
                   preferred_element_type=jnp.float32) + bo_ref[...]

    # --- residual + LayerNorm (dropout == identity in eval mode) ------------
    h1 = _layer_norm(xq + attn, ln1_g_ref[...], ln1_b_ref[...])

    # --- position-wise feed-forward ------------------------------------------
    ff = jnp.dot(h1.astype(jnp.bfloat16), w1_ref[...],
                 preferred_element_type=jnp.float32) + b1_ref[...]
    ff = jnp.maximum(ff, 0.0)
    ff = jnp.dot(ff.astype(jnp.bfloat16), w2_ref[...],
                 preferred_element_type=jnp.float32) + b2_ref[...]

    out_ref[...] = _layer_norm(h1 + ff, ln2_g_ref[...], ln2_b_ref[...])


# ----------------------------------------------------------------------------
# VMEM accounting / tile selection (generation aware).
# ----------------------------------------------------------------------------
def _vmem_budget_bytes():
    # Leave ~25% headroom for compiler-internal scratch:
    #   v7x (64 MiB/TC) -> ~48 MiB; v5e/v6e (128 MiB) -> ~96 MiB.
    try:
        cap = int(pltpu.get_tpu_info().vmem_capacity_bytes)
    except Exception:
        cap = 64 * 1024 * 1024                 # conservative (v7x per-TC size)
    return (cap * 3) // 4


def _working_set_bytes(S, H, P, n_heads, tq, tk):
    bf2, f4 = 2, 4
    dh = H // n_heads
    weights = (4 * H * H + 2 * H * P) * bf2    # bf16 matmul weights (single copy)
    small = (8 * H + P) * f4                   # biases + LN params
    x_slab = 2 * S * H * f4                    # (S,H) slab, double-buffered
    kv_scr = 2 * S * H * bf2                   # K/V VMEM scratch (bf16)
    out_blk = 2 * tq * H * f4                  # output block, double-buffered
    scores = n_heads * tq * tk * (f4 + bf2)    # s (f32) + p (bf16) per chunk
    interm = (4 * tq * H + 2 * n_heads * tq * dh + tq * P) * f4
    return weights + small + x_slab + kv_scr + out_blk + scores + interm


def _pick_tiles(S, H, P, n_heads, budget):
    """Choose (TQ, TK): TK bounds the softmax working set; TQ kept >= 256 when
    the budget allows so the MXU M-dim stays filled."""
    if S <= 512:
        tk = S
    else:
        tk = next((c for c in (512, 256, 128) if S % c == 0), S)
    if S <= 256:
        return S, tk
    cands = [c for c in (1024, 512, 256, 128) if S % c == 0] or [S]
    for tq in cands:
        if _working_set_bytes(S, H, P, n_heads, tq, tk) <= budget:
            return tq, tk
    return cands[-1], tk                       # over budget but still correct


# ----------------------------------------------------------------------------
# Wrappers.
# ----------------------------------------------------------------------------
def prepare_layer_params(params, n_heads):
    """One-time parameter prep: fold 1/sqrt(dh) into (wq, bq), cast matmul
    weights to bf16 (biases / LayerNorm params stay f32)."""
    H = params["wq"].shape[0]
    scale = 1.0 / math.sqrt(H // n_heads)
    out = {}
    for name in _PARAM_ORDER:
        w = params[name]
        if name in ("wq", "bq"):
            w = w * scale
        if name in _MATMUL_WEIGHTS:
            w = w.astype(jnp.bfloat16)
        out[name] = w
    return out


def _build_encoder_layer(x, weights, n_heads, tq, tk, vmem_limit, single_buffer):
    B, S, H = x.shape
    n_qt = S // tq

    def const_spec(shape):
        nd = len(shape)
        idx = lambda b, t, _nd=nd: (0,) * _nd
        if single_buffer:
            # Constant index map -> double buffering buys nothing; save VMEM.
            return pl.BlockSpec(shape, idx, pipeline_mode=pl.Buffered(1))
        return pl.BlockSpec(shape, idx)

    in_specs = [pl.BlockSpec((None, S, H), lambda b, t: (b, 0, 0))]  # full K/V slab per b
    in_specs += [const_spec(w.shape) for w in weights]

    return pl.pallas_call(
        functools.partial(encoder_layer_kernel, n_heads=n_heads, tq=tq, tk=tk),
        out_shape=jax.ShapeDtypeStruct((B, S, H), jnp.float32),
        grid=(B, n_qt),
        in_specs=in_specs,
        out_specs=pl.BlockSpec((None, tq, H), lambda b, t: (b, t, 0)),
        scratch_shapes=[pltpu.VMEM((S, H), jnp.bfloat16),     # cached K
                        pltpu.VMEM((S, H), jnp.bfloat16)],    # cached V
        compiler_params=pltpu.CompilerParams(
            # batch axis parallel (megacore sharding); query-tile axis must be
            # 'arbitrary' so the pl.when(t == 0) K/V scratch reuse stays valid.
            dimension_semantics=("parallel", "arbitrary"),
            vmem_limit_bytes=vmem_limit),
    )(x, *weights)


def encoder_layer(x, prepared, n_heads, tq=None, tk=None):
    global _single_buffer_ok
    B, S, H = x.shape
    P = prepared["w1"].shape[1]
    budget = _vmem_budget_bytes()
    auto_tq, auto_tk = _pick_tiles(S, H, P, n_heads, budget)
    tq = auto_tq if tq is None else tq
    tk = auto_tk if tk is None else tk
    assert S % tq == 0 and S % tk == 0, "query/key tiles must divide S"

    ws = _working_set_bytes(S, H, P, n_heads, tq, tk)
    vmem_limit = int(min(budget, max(2 * ws, 32 * 1024 * 1024)))
    weights = [prepared[name] for name in _PARAM_ORDER]

    if _single_buffer_ok is None:
        try:
            out = jax.block_until_ready(
                _build_encoder_layer(x, weights, n_heads, tq, tk, vmem_limit,
                                     single_buffer=True))
            _single_buffer_ok = True
            return out
        except Exception:
            _single_buffer_ok = False   # this JAX build rejects Buffered(1)
    return _build_encoder_layer(x, weights, n_heads, tq, tk, vmem_limit,
                                single_buffer=_single_buffer_ok)


def transformer_encoder(src, layer_params, n_heads, tq=None, tk=None):
    # TransformerEncoder.forward: _src = dropout(src) [identity in eval];
    # layer stack; then this module really does `src = src + _src`.
    prepared = [prepare_layer_params(p, n_heads) for p in layer_params]
    h = src
    for p in prepared:
        h = encoder_layer(h, p, n_heads, tq=tq, tk=tk)
    return src + h


# ----------------------------------------------------------------------------
# Pure-JAX reference (f32, un-prepared params) for correctness checking.
# ----------------------------------------------------------------------------
def _ref_layer(x, p, n_heads):
    B, S, H = x.shape
    dh = H // n_heads
    q = x @ p["wq"] + p["bq"]
    k = x @ p["wk"] + p["bk"]
    v = x @ p["wv"] + p["bv"]

    def split(t):
        return jnp.transpose(t.reshape(B, S, n_heads, dh), (0, 2, 1, 3))

    qh = split(q) / math.sqrt(dh)
    kh, vh = split(k), split(v)
    s = qh @ jnp.swapaxes(kh, -1, -2)
    ctx = jax.nn.softmax(s, axis=-1) @ vh
    ctx = jnp.transpose(ctx, (0, 2, 1, 3)).reshape(B, S, H)
    attn = ctx @ p["wo"] + p["bo"]
    h1 = _layer_norm(x + attn, p["ln1_g"], p["ln1_b"])
    ff = jnp.maximum(h1 @ p["w1"] + p["b1"], 0.0) @ p["w2"] + p["b2"]
    return _layer_norm(h1 + ff, p["ln2_g"], p["ln2_b"])


def transformer_encoder_ref(src, layer_params, n_heads):
    h = src
    for p in layer_params:
        h = _ref_layer(h, p, n_heads)
    return src + h


# ----------------------------------------------------------------------------
# Synthetic parameters matching the torch module shapes.
# ----------------------------------------------------------------------------
def init_params(key, n_layers, hidden_dim, pf_dim):
    H, P = hidden_dim, pf_dim
    layers = []
    for _ in range(n_layers):
        key, *ks = jax.random.split(key, 8)

        def nrm(k, shape):
            return jax.random.normal(k, shape, jnp.float32) * 0.02

        # torch MultiheadAttention: in_proj_weight (3H, H), in_proj_bias (3H,)
        in_proj_w = nrm(ks[0], (3 * H, H))
        in_proj_b = nrm(ks[1], (3 * H,))
        out_proj_w = nrm(ks[2], (H, H))
        fc1_w = nrm(ks[3], (P, H))
        fc1_b = nrm(ks[4], (P,))
        fc2_w = nrm(ks[5], (H, P))
        fc2_b = nrm(ks[6], (H,))

        layers.append(dict(
            wq=in_proj_w[:H].T, wk=in_proj_w[H:2 * H].T, wv=in_proj_w[2 * H:].T,
            bq=in_proj_b[:H][None, :], bk=in_proj_b[H:2 * H][None, :],
            bv=in_proj_b[2 * H:][None, :],
            # torch MHA._reset_parameters zeroes out_proj.bias; loadable anyway.
            wo=out_proj_w.T, bo=jnp.zeros((1, H), jnp.float32),
            ln1_g=jnp.ones((1, H), jnp.float32), ln1_b=jnp.zeros((1, H), jnp.float32),
            w1=fc1_w.T, b1=fc1_b[None, :],
            w2=fc2_w.T, b2=fc2_b[None, :],
            ln2_g=jnp.ones((1, H), jnp.float32), ln2_b=jnp.zeros((1, H), jnp.float32),
        ))
    return layers


if __name__ == "__main__":
    key = jax.random.PRNGKey(0)

    # Config 1: minimal shapes implied by the module's forward (B, S, hidden).
    B, S, H, NH, P, L = 2, 8, 32, 4, 64, 2
    k_src, k_par, key = jax.random.split(key, 3)
    src = jax.random.normal(k_src, (B, S, H), jnp.float32)
    params = init_params(k_par, L, H, P)
    out = jax.block_until_ready(transformer_encoder(src, params, NH))
    assert out.shape == (B, S, H)
    assert bool(jnp.all(jnp.isfinite(out)))
    err = float(jnp.max(jnp.abs(out - transformer_encoder_ref(src, params, NH))))
    assert err < 1e-1, f"config1 mismatch vs reference: max abs err {err}"

    # Config 2: exercises query tiling + cached K/V reuse (2 query tiles) and
    # the flash-style K-chunk loop (2 chunks of 128).
    B2, S2, H2, NH2, P2 = 2, 256, 128, 4, 256
    k_src2, k_par2 = jax.random.split(key)
    src2 = jax.random.normal(k_src2, (B2, S2, H2), jnp.float32)
    params2 = init_params(k_par2, 1, H2, P2)
    out2 = jax.block_until_ready(
        transformer_encoder(src2, params2, NH2, tq=128, tk=128))
    assert out2.shape == (B2, S2, H2)
    assert bool(jnp.all(jnp.isfinite(out2)))
    err2 = float(jnp.max(jnp.abs(out2 - transformer_encoder_ref(src2, params2, NH2))))
    assert err2 < 1e-1, f"config2 mismatch vs reference: max abs err {err2}"

    print("KERNEL_OK")
</pallas_src>

<mosaic_0001>
module attributes {stable_mosaic.version = 11 : i64} {
  func.func @encoder_layer_kernel(%arg0: i32, %arg1: i32, %arg2: memref<1x8x32xf32, #tpu.memory_space<vmem>>, %arg3: memref<32x32xbf16, #tpu.memory_space<vmem>>, %arg4: memref<32x32xbf16, #tpu.memory_space<vmem>>, %arg5: memref<32x32xbf16, #tpu.memory_space<vmem>>, %arg6: memref<1x32xf32, #tpu.memory_space<vmem>>, %arg7: memref<1x32xf32, #tpu.memory_space<vmem>>, %arg8: memref<1x32xf32, #tpu.memory_space<vmem>>, %arg9: memref<32x32xbf16, #tpu.memory_space<vmem>>, %arg10: memref<1x32xf32, #tpu.memory_space<vmem>>, %arg11: memref<1x32xf32, #tpu.memory_space<vmem>>, %arg12: memref<1x32xf32, #tpu.memory_space<vmem>>, %arg13: memref<32x64xbf16, #tpu.memory_space<vmem>>, %arg14: memref<1x64xf32, #tpu.memory_space<vmem>>, %arg15: memref<64x32xbf16, #tpu.memory_space<vmem>>, %arg16: memref<1x32xf32, #tpu.memory_space<vmem>>, %arg17: memref<1x32xf32, #tpu.memory_space<vmem>>, %arg18: memref<1x32xf32, #tpu.memory_space<vmem>>, %arg19: memref<1x8x32xf32, #tpu.memory_space<vmem>>, %arg20: memref<8x32xbf16, #tpu.memory_space<vmem>>, %arg21: memref<8x32xbf16, #tpu.memory_space<vmem>>) attributes {dimension_semantics = [#tpu.dimension_semantics<parallel>, #tpu.dimension_semantics<arbitrary>], iteration_bounds = array<i64: 2, 1>, scalar_prefetch = 0 : i64, scratch_operands = 2 : i64, tpu.core_type = #tpu.core_type<tc>, window_params = [{transform_indices = @transform_0, window_bounds = array<i64: 1, 8, 32>}, {pipeline_mode = #tpu.pipeline_mode<synchronous>, transform_indices = @transform_1, window_bounds = array<i64: 32, 32>}, {pipeline_mode = #tpu.pipeline_mode<synchronous>, transform_indices = @transform_2, window_bounds = array<i64: 32, 32>}, {pipeline_mode = #tpu.pipeline_mode<synchronous>, transform_indices = @transform_3, window_bounds = array<i64: 32, 32>}, {pipeline_mode = #tpu.pipeline_mode<synchronous>, transform_indices = @transform_4, window_bounds = array<i64: 1, 32>}, {pipeline_mode = #tpu.pipeline_mode<synchronous>, transform_indices = @transform_5, window_bounds = array<i64: 1, 32>}, {pipeline_mode = #tpu.pipeline_mode<synchronous>, transform_indices = @transform_6, window_bounds = array<i64: 1, 32>}, {pipeline_mode = #tpu.pipeline_mode<synchronous>, transform_indices = @transform_7, window_bounds = array<i64: 32, 32>}, {pipeline_mode = #tpu.pipeline_mode<synchronous>, transform_indices = @transform_8, window_bounds = array<i64: 1, 32>}, {pipeline_mode = #tpu.pipeline_mode<synchronous>, transform_indices = @transform_9, window_bounds = array<i64: 1, 32>}, {pipeline_mode = #tpu.pipeline_mode<synchronous>, transform_indices = @transform_10, window_bounds = array<i64: 1, 32>}, {pipeline_mode = #tpu.pipeline_mode<synchronous>, transform_indices = @transform_11, window_bounds = array<i64: 32, 64>}, {pipeline_mode = #tpu.pipeline_mode<synchronous>, transform_indices = @transform_12, window_bounds = array<i64: 1, 64>}, {pipeline_mode = #tpu.pipeline_mode<synchronous>, transform_indices = @transform_13, window_bounds = array<i64: 64, 32>}, {pipeline_mode = #tpu.pipeline_mode<synchronous>, transform_indices = @transform_14, window_bounds = array<i64: 1, 32>}, {pipeline_mode = #tpu.pipeline_mode<synchronous>, transform_indices = @transform_15, window_bounds = array<i64: 1, 32>}, {pipeline_mode = #tpu.pipeline_mode<synchronous>, transform_indices = @transform_16, window_bounds = array<i64: 1, 32>}, {transform_indices = @transform_17, window_bounds = array<i64: 1, 8, 32>}]} {
    %c0_i32 = arith.constant 0 : i32
    %0 = arith.cmpi eq, %arg1, %c0_i32 : i32
    %1 = arith.extui %0 : i1 to i32
    %c0_i32_0 = arith.constant 0 : i32
    %2 = arith.cmpi ne, %1, %c0_i32_0 : i32
    scf.if %2 {
      %c0_54 = arith.constant 0 : index
      %c0_55 = arith.constant 0 : index
      %c0_56 = arith.constant 0 : index
      %119 = vector.load %arg2[%c0_54, %c0_55, %c0_56] : memref<1x8x32xf32, #tpu.memory_space<vmem>>, vector<1x8x32xf32>
      %120 = vector.shape_cast %119 : vector<1x8x32xf32> to vector<8x32xf32>
      %121 = arith.truncf %120 : vector<8x32xf32> to vector<8x32xbf16>
      %c0_57 = arith.constant 0 : index
      %c0_58 = arith.constant 0 : index
      %122 = vector.load %arg4[%c0_57, %c0_58] : memref<32x32xbf16, #tpu.memory_space<vmem>>, vector<32x32xbf16>
      %cst_59 = arith.constant dense<0.000000e+00> : vector<8x32xf32>
      %123 = tpu.matmul %121, %122, %cst_59 {dimension_numbers = #tpu.dot_dimension_numbers<[1], [0], [0], [1], [0, 0, 1, 1], [], []>} : vector<8x32xbf16>, vector<32x32xbf16>, vector<8x32xf32> -> vector<8x32xf32>
      %c0_60 = arith.constant 0 : index
      %c0_61 = arith.constant 0 : index
      %124 = vector.load %arg7[%c0_60, %c0_61] : memref<1x32xf32, #tpu.memory_space<vmem>>, vector<1x32xf32>
      %125 = vector.broadcast %124 : vector<1x32xf32> to vector<8x32xf32>
      %126 = arith.addf %123, %125 : vector<8x32xf32>
      %c0_62 = arith.constant 0 : index
      %c0_63 = arith.constant 0 : index
      %127 = vector.load %arg5[%c0_62, %c0_63] : memref<32x32xbf16, #tpu.memory_space<vmem>>, vector<32x32xbf16>
      %cst_64 = arith.constant dense<0.000000e+00> : vector<8x32xf32>
      %128 = tpu.matmul %121, %127, %cst_64 {dimension_numbers = #tpu.dot_dimension_numbers<[1], [0], [0], [1], [0, 0, 1, 1], [], []>} : vector<8x32xbf16>, vector<32x32xbf16>, vector<8x32xf32> -> vector<8x32xf32>
      %c0_65 = arith.constant 0 : index
      %c0_66 = arith.constant 0 : index
      %129 = vector.load %arg8[%c0_65, %c0_66] : memref<1x32xf32, #tpu.memory_space<vmem>>, vector<1x32xf32>
      %130 = vector.broadcast %129 : vector<1x32xf32> to vector<8x32xf32>
      %131 = arith.addf %128, %130 : vector<8x32xf32>
      %132 = arith.truncf %126 : vector<8x32xf32> to vector<8x32xbf16>
      %c0_67 = arith.constant 0 : index
      %c0_68 = arith.constant 0 : index
      %133 = vector.load %arg20[%c0_67, %c0_68] : memref<8x32xbf16, #tpu.memory_space<vmem>>, vector<8x32xbf16>
      tpu.vector_store %arg20[%c0_67, %c0_68], %132 {strides = array<i32>} : memref<8x32xbf16, #tpu.memory_space<vmem>>, vector<8x32xbf16>,
      %134 = arith.truncf %131 : vector<8x32xf32> to vector<8x32xbf16>
      %c0_69 = arith.constant 0 : index
      %c0_70 = arith.constant 0 : index
      %135 = vector.load %arg21[%c0_69, %c0_70] : memref<8x32xbf16, #tpu.memory_space<vmem>>, vector<8x32xbf16>
      tpu.vector_store %arg21[%c0_69, %c0_70], %134 {strides = array<i32>} : memref<8x32xbf16, #tpu.memory_space<vmem>>, vector<8x32xbf16>,
    } else {
    }
    %c8_i32 = arith.constant 8 : i32
    %3 = arith.muli %arg1, %c8_i32 : i32
    %4 = tpu.assume_multiple %3, 8 : i32
    %c0 = arith.constant 0 : index
    %5 = arith.index_cast %4 : i32 to index
    %c0_1 = arith.constant 0 : index
    %6 = vector.load %arg2[%c0, %5, %c0_1] : memref<1x8x32xf32, #tpu.memory_space<vmem>>, vector<1x8x32xf32>
    %7 = vector.shape_cast %6 : vector<1x8x32xf32> to vector<8x32xf32>
    %8 = arith.truncf %7 : vector<8x32xf32> to vector<8x32xbf16>
    %c0_2 = arith.constant 0 : index
    %c0_3 = arith.constant 0 : index
    %9 = vector.load %arg3[%c0_2, %c0_3] : memref<32x32xbf16, #tpu.memory_space<vmem>>, vector<32x32xbf16>
    %cst = arith.constant dense<0.000000e+00> : vector<8x32xf32>
    %10 = tpu.matmul %8, %9, %cst {dimension_numbers = #tpu.dot_dimension_numbers<[1], [0], [0], [1], [0, 0, 1, 1], [], []>} : vector<8x32xbf16>, vector<32x32xbf16>, vector<8x32xf32> -> vector<8x32xf32>
    %c0_4 = arith.constant 0 : index
    %c0_5 = arith.constant 0 : index
    %11 = vector.load %arg6[%c0_4, %c0_5] : memref<1x32xf32, #tpu.memory_space<vmem>>, vector<1x32xf32>
    %12 = vector.broadcast %11 : vector<1x32xf32> to vector<8x32xf32>
    %13 = arith.addf %10, %12 : vector<8x32xf32>
    %14 = vector.shape_cast %13 : vector<8x32xf32> to vector<8x4x8xf32>
    %15 = arith.truncf %14 : vector<8x4x8xf32> to vector<8x4x8xbf16>
    %cst_6 = arith.constant -1.000000e+30 : f32
    %16 = vector.broadcast %cst_6 : f32 to vector<4x8x1xf32>
    %cst_7 = arith.constant 0.000000e+00 : f32
    %17 = vector.broadcast %cst_7 : f32 to vector<4x8x1xf32>
    %cst_8 = arith.constant 0.000000e+00 : f32
    %18 = vector.broadcast %cst_8 : f32 to vector<4x8x8xf32>
    %c0_9 = arith.constant 0 : index
    %c0_10 = arith.constant 0 : index
    %19 = vector.load %arg20[%c0_9, %c0_10] : memref<8x32xbf16, #tpu.memory_space<vmem>>, vector<8x32xbf16>
    %20 = vector.shape_cast %19 : vector<8x32xbf16> to vector<8x4x8xbf16>
    %c0_11 = arith.constant 0 : index
    %c0_12 = arith.constant 0 : index
    %21 = vector.load %arg21[%c0_11, %c0_12] : memref<8x32xbf16, #tpu.memory_space<vmem>>, vector<8x32xbf16>
    %22 = vector.shape_cast %21 : vector<8x32xbf16> to vector<8x4x8xbf16>
    "tpu.trace_start"() <{level = 10 : i32, message = "qhd,khd->hqk"}> : () -> ()
    %cst_13 = arith.constant dense<0.000000e+00> : vector<4x8x8xf32>
    %23 = tpu.matmul %15, %20, %cst_13 {dimension_numbers = #tpu.dot_dimension_numbers<[2], [2], [0], [0], [0, 1, 0, 0, 1, 0], [1], [1]>} : vector<8x4x8xbf16>, vector<8x4x8xbf16>, vector<4x8x8xf32> -> vector<4x8x8xf32>
    "tpu.trace_stop"() : () -> ()
    %cst_14 = arith.constant dense<0xFF800000> : vector<4x8xf32>
    %24 = vector.multi_reduction <maximumf>, %23, %cst_14 [2] : vector<4x8x8xf32> to vector<4x8xf32>
    %25 = vector.shape_cast %24 : vector<4x8xf32> to vector<4x8x1xf32>
    %26 = arith.maximumf %16, %25 : vector<4x8x1xf32>
    %27 = arith.subf %16, %26 : vector<4x8x1xf32>
    %28 = math.exp %27 : vector<4x8x1xf32>
    %29 = vector.broadcast %26 : vector<4x8x1xf32> to vector<4x8x8xf32>
    %30 = arith.subf %23, %29 : vector<4x8x8xf32>
    %31 = math.exp %30 : vector<4x8x8xf32>
    %32 = arith.mulf %28, %17 : vector<4x8x1xf32>
    %cst_15 = arith.constant dense<0.000000e+00> : vector<4x8xf32>
    %33 = vector.multi_reduction <add>, %31, %cst_15 [2] : vector<4x8x8xf32> to vector<4x8xf32>
    %34 = vector.shape_cast %33 : vector<4x8xf32> to vector<4x8x1xf32>
    %35 = arith.addf %32, %34 : vector<4x8x1xf32>
    %36 = arith.truncf %31 : vector<4x8x8xf32> to vector<4x8x8xbf16>
    "tpu.trace_start"() <{level = 10 : i32, message = "hqk,khd->hqd"}> : () -> ()
    %cst_16 = arith.constant dense<0.000000e+00> : vector<4x8x8xf32>
    %37 = tpu.matmul %36, %22, %cst_16 {dimension_numbers = #tpu.dot_dimension_numbers<[2], [0], [1], [2], [0, 0, 0, 1, 1, 2], [0], [1]>} : vector<4x8x8xbf16>, vector<8x4x8xbf16>, vector<4x8x8xf32> -> vector<4x8x8xf32>
    "tpu.trace_stop"() : () -> ()
    %38 = vector.broadcast %28 : vector<4x8x1xf32> to vector<4x8x8xf32>
    %39 = arith.mulf %38, %18 : vector<4x8x8xf32>
    %40 = arith.addf %39, %37 : vector<4x8x8xf32>
    %41 = tpu.reciprocal %35 {approx = true} : vector<4x8x1xf32> -> vector<4x8x1xf32>
    %42 = vector.broadcast %41 : vector<4x8x1xf32> to vector<4x8x8xf32>
    %43 = arith.mulf %40, %42 : vector<4x8x8xf32>
    %44 = tpu.transpose %43, [1, 0, 2] : vector<4x8x8xf32> -> vector<8x4x8xf32>
    %45 = vector.shape_cast %44 : vector<8x4x8xf32> to vector<8x32xf32>
    %46 = arith.truncf %45 : vector<8x32xf32> to vector<8x32xbf16>
    %c0_17 = arith.constant 0 : index
    %c0_18 = arith.constant 0 : index
    %47 = vector.load %arg9[%c0_17, %c0_18] : memref<32x32xbf16, #tpu.memory_space<vmem>>, vector<32x32xbf16>
    %cst_19 = arith.constant dense<0.000000e+00> : vector<8x32xf32>
    %48 = tpu.matmul %46, %47, %cst_19 {dimension_numbers = #tpu.dot_dimension_numbers<[1], [0], [0], [1], [0, 0, 1, 1], [], []>} : vector<8x32xbf16>, vector<32x32xbf16>, vector<8x32xf32> -> vector<8x32xf32>
    %c0_20 = arith.constant 0 : index
    %c0_21 = arith.constant 0 : index
    %49 = vector.load %arg10[%c0_20, %c0_21] : memref<1x32xf32, #tpu.memory_space<vmem>>, vector<1x32xf32>
    %50 = vector.broadcast %49 : vector<1x32xf32> to vector<8x32xf32>
    %51 = arith.addf %48, %50 : vector<8x32xf32>
    %52 = arith.addf %7, %51 : vector<8x32xf32>
    %c0_22 = arith.constant 0 : index
    %c0_23 = arith.constant 0 : index
    %53 = vector.load %arg11[%c0_22, %c0_23] : memref<1x32xf32, #tpu.memory_space<vmem>>, vector<1x32xf32>
    %c0_24 = arith.constant 0 : index
    %c0_25 = arith.constant 0 : index
    %54 = vector.load %arg12[%c0_24, %c0_25] : memref<1x32xf32, #tpu.memory_space<vmem>>, vector<1x32xf32>
    %cst_26 = arith.constant dense<0.000000e+00> : vector<8xf32>
    %55 = vector.multi_reduction <add>, %52, %cst_26 [1] : vector<8x32xf32> to vector<8xf32>
    %56 = vector.shape_cast %55 : vector<8xf32> to vector<8x1xf32>
    %cst_27 = arith.constant 3.200000e+01 : f32
    %57 = vector.broadcast %cst_27 : f32 to vector<8x1xf32>
    %58 = arith.divf %56, %57 : vector<8x1xf32>
    %59 = vector.broadcast %58 : vector<8x1xf32> to vector<8x32xf32>
    %60 = arith.subf %52, %59 : vector<8x32xf32>
    %61 = arith.mulf %60, %60 : vector<8x32xf32>
    %cst_28 = arith.constant dense<0.000000e+00> : vector<8xf32>
    %62 = vector.multi_reduction <add>, %61, %cst_28 [1] : vector<8x32xf32> to vector<8xf32>
    %63 = vector.shape_cast %62 : vector<8xf32> to vector<8x1xf32>
    %cst_29 = arith.constant 3.200000e+01 : f32
    %64 = vector.broadcast %cst_29 : f32 to vector<8x1xf32>
    %65 = arith.divf %63, %64 : vector<8x1xf32>
    %66 = vector.broadcast %58 : vector<8x1xf32> to vector<8x32xf32>
    %67 = arith.subf %52, %66 : vector<8x32xf32>
    %cst_30 = arith.constant 9.99999974E-6 : f32
    %68 = vector.broadcast %cst_30 : f32 to vector<8x1xf32>
    %69 = arith.addf %65, %68 : vector<8x1xf32>
    %70 = math.rsqrt %69 : vector<8x1xf32>
    %71 = vector.broadcast %70 : vector<8x1xf32> to vector<8x32xf32>
    %72 = arith.mulf %67, %71 : vector<8x32xf32>
    %73 = vector.broadcast %53 : vector<1x32xf32> to vector<8x32xf32>
    %74 = arith.mulf %72, %73 : vector<8x32xf32>
    %75 = vector.broadcast %54 : vector<1x32xf32> to vector<8x32xf32>
    %76 = arith.addf %74, %75 : vector<8x32xf32>
    %77 = arith.truncf %76 : vector<8x32xf32> to vector<8x32xbf16>
    %c0_31 = arith.constant 0 : index
    %c0_32 = arith.constant 0 : index
    %78 = vector.load %arg13[%c0_31, %c0_32] : memref<32x64xbf16, #tpu.memory_space<vmem>>, vector<32x64xbf16>
    %cst_33 = arith.constant dense<0.000000e+00> : vector<8x64xf32>
    %79 = tpu.matmul %77, %78, %cst_33 {dimension_numbers = #tpu.dot_dimension_numbers<[1], [0], [0], [1], [0, 0, 1, 1], [], []>} : vector<8x32xbf16>, vector<32x64xbf16>, vector<8x64xf32> -> vector<8x64xf32>
    %c0_34 = arith.constant 0 : index
    %c0_35 = arith.constant 0 : index
    %80 = vector.load %arg14[%c0_34, %c0_35] : memref<1x64xf32, #tpu.memory_space<vmem>>, vector<1x64xf32>
    %81 = vector.broadcast %80 : vector<1x64xf32> to vector<8x64xf32>
    %82 = arith.addf %79, %81 : vector<8x64xf32>
    %cst_36 = arith.constant 0.000000e+00 : f32
    %83 = vector.broadcast %cst_36 : f32 to vector<8x64xf32>
    %84 = arith.maximumf %82, %83 : vector<8x64xf32>
    %85 = arith.truncf %84 : vector<8x64xf32> to vector<8x64xbf16>
    %c0_37 = arith.constant 0 : index
    %c0_38 = arith.constant 0 : index
    %86 = vector.load %arg15[%c0_37, %c0_38] : memref<64x32xbf16, #tpu.memory_space<vmem>>, vector<64x32xbf16>
    %cst_39 = arith.constant dense<0.000000e+00> : vector<8x32xf32>
    %87 = tpu.matmul %85, %86, %cst_39 {dimension_numbers = #tpu.dot_dimension_numbers<[1], [0], [0], [1], [0, 0, 1, 1], [], []>} : vector<8x64xbf16>, vector<64x32xbf16>, vector<8x32xf32> -> vector<8x32xf32>
    %c0_40 = arith.constant 0 : index
    %c0_41 = arith.constant 0 : index
    %88 = vector.load %arg16[%c0_40, %c0_41] : memref<1x32xf32, #tpu.memory_space<vmem>>, vector<1x32xf32>
    %89 = vector.broadcast %88 : vector<1x32xf32> to vector<8x32xf32>
    %90 = arith.addf %87, %89 : vector<8x32xf32>
    %91 = arith.addf %76, %90 : vector<8x32xf32>
    %c0_42 = arith.constant 0 : index
    %c0_43 = arith.constant 0 : index
    %92 = vector.load %arg17[%c0_42, %c0_43] : memref<1x32xf32, #tpu.memory_space<vmem>>, vector<1x32xf32>
    %c0_44 = arith.constant 0 : index
    %c0_45 = arith.constant 0 : index
    %93 = vector.load %arg18[%c0_44, %c0_45] : memref<1x32xf32, #tpu.memory_space<vmem>>, vector<1x32xf32>
    %cst_46 = arith.constant dense<0.000000e+00> : vector<8xf32>
    %94 = vector.multi_reduction <add>, %91, %cst_46 [1] : vector<8x32xf32> to vector<8xf32>
    %95 = vector.shape_cast %94 : vector<8xf32> to vector<8x1xf32>
    %cst_47 = arith.constant 3.200000e+01 : f32
    %96 = vector.broadcast %cst_47 : f32 to vector<8x1xf32>
    %97 = arith.divf %95, %96 : vector<8x1xf32>
    %98 = vector.broadcast %97 : vector<8x1xf32> to vector<8x32xf32>
    %99 = arith.subf %91, %98 : vector<8x32xf32>
    %100 = arith.mulf %99, %99 : vector<8x32xf32>
    %cst_48 = arith.constant dense<0.000000e+00> : vector<8xf32>
    %101 = vector.multi_reduction <add>, %100, %cst_48 [1] : vector<8x32xf32> to vector<8xf32>
    %102 = vector.shape_cast %101 : vector<8xf32> to vector<8x1xf32>
    %cst_49 = arith.constant 3.200000e+01 : f32
    %103 = vector.broadcast %cst_49 : f32 to vector<8x1xf32>
    %104 = arith.divf %102, %103 : vector<8x1xf32>
    %105 = vector.broadcast %97 : vector<8x1xf32> to vector<8x32xf32>
    %106 = arith.subf %91, %105 : vector<8x32xf32>
    %cst_50 = arith.constant 9.99999974E-6 : f32
    %107 = vector.broadcast %cst_50 : f32 to vector<8x1xf32>
    %108 = arith.addf %104, %107 : vector<8x1xf32>
    %109 = math.rsqrt %108 : vector<8x1xf32>
    %110 = vector.broadcast %109 : vector<8x1xf32> to vector<8x32xf32>
    %111 = arith.mulf %106, %110 : vector<8x32xf32>
    %112 = vector.broadcast %92 : vector<1x32xf32> to vector<8x32xf32>
    %113 = arith.mulf %111, %112 : vector<8x32xf32>
    %114 = vector.broadcast %93 : vector<1x32xf32> to vector<8x32xf32>
    %115 = arith.addf %113, %114 : vector<8x32xf32>
    %c0_51 = arith.constant 0 : index
    %c0_52 = arith.constant 0 : index
    %c0_53 = arith.constant 0 : index
    %116 = vector.load %arg19[%c0_51, %c0_52, %c0_53] : memref<1x8x32xf32, #tpu.memory_space<vmem>>, vector<1x8x32xf32>
    %117 = vector.shape_cast %116 : vector<1x8x32xf32> to vector<8x32xf32>
    %118 = vector.shape_cast %115 : vector<8x32xf32> to vector<1x8x32xf32>
    tpu.vector_store %arg19[%c0_51, %c0_52, %c0_53], %118 {strides = array<i32>} : memref<1x8x32xf32, #tpu.memory_space<vmem>>, vector<1x8x32xf32>,
    return
  }
  func.func @transform_0(%arg0: i32, %arg1: i32) -> (i32, i32, i32) {
    %c0_i32 = arith.constant 0 : i32
    %c0_i32_0 = arith.constant 0 : i32
    %c0_i32_1 = arith.constant 0 : i32
    return %arg0, %c0_i32, %c0_i32_0 : i32, i32, i32
  }
  func.func @transform_1(%arg0: i32, %arg1: i32) -> (i32, i32) {
    %c0_i32 = arith.constant 0 : i32
    %c0_i32_0 = arith.constant 0 : i32
    %c0_i32_1 = arith.constant 0 : i32
    return %c0_i32, %c0_i32_0 : i32, i32
  }
  func.func @transform_2(%arg0: i32, %arg1: i32) -> (i32, i32) {
    %c0_i32 = arith.constant 0 : i32
    %c0_i32_0 = arith.constant 0 : i32
    %c0_i32_1 = arith.constant 0 : i32
    return %c0_i32, %c0_i32_0 : i32, i32
  }
  func.func @transform_3(%arg0: i32, %arg1: i32) -> (i32, i32) {
    %c0_i32 = arith.constant 0 : i32
    %c0_i32_0 = arith.constant 0 : i32
    %c0_i32_1 = arith.constant 0 : i32
    return %c0_i32, %c0_i32_0 : i32, i32
  }
  func.func @transform_4(%arg0: i32, %arg1: i32) -> (i32, i32) {
    %c0_i32 = arith.constant 0 : i32
    %c0_i32_0 = arith.constant 0 : i32
    %c0_i32_1 = arith.constant 0 : i32
    return %c0_i32, %c0_i32_0 : i32, i32
  }
  func.func @transform_5(%arg0: i32, %arg1: i32) -> (i32, i32) {
    %c0_i32 = arith.constant 0 : i32
    %c0_i32_0 = arith.constant 0 : i32
    %c0_i32_1 = arith.constant 0 : i32
    return %c0_i32, %c0_i32_0 : i32, i32
  }
  func.func @transform_6(%arg0: i32, %arg1: i32) -> (i32, i32) {
    %c0_i32 = arith.constant 0 : i32
    %c0_i32_0 = arith.constant 0 : i32
    %c0_i32_1 = arith.constant 0 : i32
    return %c0_i32, %c0_i32_0 : i32, i32
  }
  func.func @transform_7(%arg0: i32, %arg1: i32) -> (i32, i32) {
    %c0_i32 = arith.constant 0 : i32
    %c0_i32_0 = arith.constant 0 : i32
    %c0_i32_1 = arith.constant 0 : i32
    return %c0_i32, %c0_i32_0 : i32, i32
  }
  func.func @transform_8(%arg0: i32, %arg1: i32) -> (i32, i32) {
    %c0_i32 = arith.constant 0 : i32
    %c0_i32_0 = arith.constant 0 : i32
    %c0_i32_1 = arith.constant 0 : i32
    return %c0_i32, %c0_i32_0 : i32, i32
  }
  func.func @transform_9(%arg0: i32, %arg1: i32) -> (i32, i32) {
    %c0_i32 = arith.constant 0 : i32
    %c0_i32_0 = arith.constant 0 : i32
    %c0_i32_1 = arith.constant 0 : i32
    return %c0_i32, %c0_i32_0 : i32, i32
  }
  func.func @transform_10(%arg0: i32, %arg1: i32) -> (i32, i32) {
    %c0_i32 = arith.constant 0 : i32
    %c0_i32_0 = arith.constant 0 : i32
    %c0_i32_1 = arith.constant 0 : i32
    return %c0_i32, %c0_i32_0 : i32, i32
  }
  func.func @transform_11(%arg0: i32, %arg1: i32) -> (i32, i32) {
    %c0_i32 = arith.constant 0 : i32
    %c0_i32_0 = arith.constant 0 : i32
    %c0_i32_1 = arith.constant 0 : i32
    return %c0_i32, %c0_i32_0 : i32, i32
  }
  func.func @transform_12(%arg0: i32, %arg1: i32) -> (i32, i32) {
    %c0_i32 = arith.constant 0 : i32
    %c0_i32_0 = arith.constant 0 : i32
    %c0_i32_1 = arith.constant 0 : i32
    return %c0_i32, %c0_i32_0 : i32, i32
  }
  func.func @transform_13(%arg0: i32, %arg1: i32) -> (i32, i32) {
    %c0_i32 = arith.constant 0 : i32
    %c0_i32_0 = arith.constant 0 : i32
    %c0_i32_1 = arith.constant 0 : i32
    return %c0_i32, %c0_i32_0 : i32, i32
  }
  func.func @transform_14(%arg0: i32, %arg1: i32) -> (i32, i32) {
    %c0_i32 = arith.constant 0 : i32
    %c0_i32_0 = arith.constant 0 : i32
    %c0_i32_1 = arith.constant 0 : i32
    return %c0_i32, %c0_i32_0 : i32, i32
  }
  func.func @transform_15(%arg0: i32, %arg1: i32) -> (i32, i32) {
    %c0_i32 = arith.constant 0 : i32
    %c0_i32_0 = arith.constant 0 : i32
    %c0_i32_1 = arith.constant 0 : i32
    return %c0_i32, %c0_i32_0 : i32, i32
  }
  func.func @transform_16(%arg0: i32, %arg1: i32) -> (i32, i32) {
    %c0_i32 = arith.constant 0 : i32
    %c0_i32_0 = arith.constant 0 : i32
    %c0_i32_1 = arith.constant 0 : i32
    return %c0_i32, %c0_i32_0 : i32, i32
  }
  func.func @transform_17(%arg0: i32, %arg1: i32) -> (i32, i32, i32) {
    %c0_i32 = arith.constant 0 : i32
    %c0_i32_0 = arith.constant 0 : i32
    return %arg0, %arg1, %c0_i32 : i32, i32, i32
  }
}

module attributes {stable_mosaic.version = 11 : i64} {
  func.func @encoder_layer_kernel(%arg0: i32, %arg1: i32, %arg2: memref<1x8x32xf32, #tpu.memory_space<vmem>>, %arg3: memref<32x32xbf16, #tpu.memory_space<vmem>>, %arg4: memref<32x32xbf16, #tpu.memory_space<vmem>>, %arg5: memref<32x32xbf16, #tpu.memory_space<vmem>>, %arg6: memref<1x32xf32, #tpu.memory_space<vmem>>, %arg7: memref<1x32xf32, #tpu.memory_space<vmem>>, %arg8: memref<1x32xf32, #tpu.memory_space<vmem>>, %arg9: memref<32x32xbf16, #tpu.memory_space<vmem>>, %arg10: memref<1x32xf32, #tpu.memory_space<vmem>>, %arg11: memref<1x32xf32, #tpu.memory_space<vmem>>, %arg12: memref<1x32xf32, #tpu.memory_space<vmem>>, %arg13: memref<32x64xbf16, #tpu.memory_space<vmem>>, %arg14: memref<1x64xf32, #tpu.memory_space<vmem>>, %arg15: memref<64x32xbf16, #tpu.memory_space<vmem>>, %arg16: memref<1x32xf32, #tpu.memory_space<vmem>>, %arg17: memref<1x32xf32, #tpu.memory_space<vmem>>, %arg18: memref<1x32xf32, #tpu.memory_space<vmem>>, %arg19: memref<1x8x32xf32, #tpu.memory_space<vmem>>, %arg20: memref<8x32xbf16, #tpu.memory_space<vmem>>, %arg21: memref<8x32xbf16, #tpu.memory_space<vmem>>) attributes {dimension_semantics = [#tpu.dimension_semantics<parallel>, #tpu.dimension_semantics<arbitrary>], iteration_bounds = array<i64: 2, 1>, scalar_prefetch = 0 : i64, scratch_operands = 2 : i64, tpu.core_type = #tpu.core_type<tc>, window_params = [{transform_indices = @transform_0, window_bounds = array<i64: 1, 8, 32>}, {pipeline_mode = #tpu.pipeline_mode<synchronous>, transform_indices = @transform_1, window_bounds = array<i64: 32, 32>}, {pipeline_mode = #tpu.pipeline_mode<synchronous>, transform_indices = @transform_2, window_bounds = array<i64: 32, 32>}, {pipeline_mode = #tpu.pipeline_mode<synchronous>, transform_indices = @transform_3, window_bounds = array<i64: 32, 32>}, {pipeline_mode = #tpu.pipeline_mode<synchronous>, transform_indices = @transform_4, window_bounds = array<i64: 1, 32>}, {pipeline_mode = #tpu.pipeline_mode<synchronous>, transform_indices = @transform_5, window_bounds = array<i64: 1, 32>}, {pipeline_mode = #tpu.pipeline_mode<synchronous>, transform_indices = @transform_6, window_bounds = array<i64: 1, 32>}, {pipeline_mode = #tpu.pipeline_mode<synchronous>, transform_indices = @transform_7, window_bounds = array<i64: 32, 32>}, {pipeline_mode = #tpu.pipeline_mode<synchronous>, transform_indices = @transform_8, window_bounds = array<i64: 1, 32>}, {pipeline_mode = #tpu.pipeline_mode<synchronous>, transform_indices = @transform_9, window_bounds = array<i64: 1, 32>}, {pipeline_mode = #tpu.pipeline_mode<synchronous>, transform_indices = @transform_10, window_bounds = array<i64: 1, 32>}, {pipeline_mode = #tpu.pipeline_mode<synchronous>, transform_indices = @transform_11, window_bounds = array<i64: 32, 64>}, {pipeline_mode = #tpu.pipeline_mode<synchronous>, transform_indices = @transform_12, window_bounds = array<i64: 1, 64>}, {pipeline_mode = #tpu.pipeline_mode<synchronous>, transform_indices = @transform_13, window_bounds = array<i64: 64, 32>}, {pipeline_mode = #tpu.pipeline_mode<synchronous>, transform_indices = @transform_14, window_bounds = array<i64: 1, 32>}, {pipeline_mode = #tpu.pipeline_mode<synchronous>, transform_indices = @transform_15, window_bounds = array<i64: 1, 32>}, {pipeline_mode = #tpu.pipeline_mode<synchronous>, transform_indices = @transform_16, window_bounds = array<i64: 1, 32>}, {transform_indices = @transform_17, window_bounds = array<i64: 1, 8, 32>}]} {
    %c0_i32 = arith.constant 0 : i32
    %0 = arith.cmpi eq, %arg1, %c0_i32 : i32
    %1 = arith.extui %0 : i1 to i32
    %c0_i32_0 = arith.constant 0 : i32
    %2 = arith.cmpi ne, %1, %c0_i32_0 : i32
    scf.if %2 {
      %c0_54 = arith.constant 0 : index
      %c0_55 = arith.constant 0 : index
      %c0_56 = arith.constant 0 : index
      %119 = vector.load %arg2[%c0_54, %c0_55, %c0_56] : memref<1x8x32xf32, #tpu.memory_space<vmem>>, vector<1x8x32xf32>
      %120 = vector.shape_cast %119 : vector<1x8x32xf32> to vector<8x32xf32>
      %121 = arith.truncf %120 : vector<8x32xf32> to vector<8x32xbf16>
      %c0_57 = arith.constant 0 : index
      %c0_58 = arith.constant 0 : index
      %122 = vector.load %arg4[%c0_57, %c0_58] : memref<32x32xbf16, #tpu.memory_space<vmem>>, vector<32x32xbf16>
      %cst_59 = arith.constant dense<0.000000e+00> : vector<8x32xf32>
      %123 = tpu.matmul %121, %122, %cst_59 {dimension_numbers = #tpu.dot_dimension_numbers<[1], [0], [0], [1], [0, 0, 1, 1], [], []>} : vector<8x32xbf16>, vector<32x32xbf16>, vector<8x32xf32> -> vector<8x32xf32>
      %c0_60 = arith.constant 0 : index
      %c0_61 = arith.constant 0 : index
      %124 = vector.load %arg7[%c0_60, %c0_61] : memref<1x32xf32, #tpu.memory_space<vmem>>, vector<1x32xf32>
      %125 = vector.broadcast %124 : vector<1x32xf32> to vector<8x32xf32>
      %126 = arith.addf %123, %125 : vector<8x32xf32>
      %c0_62 = arith.constant 0 : index
      %c0_63 = arith.constant 0 : index
      %127 = vector.load %arg5[%c0_62, %c0_63] : memref<32x32xbf16, #tpu.memory_space<vmem>>, vector<32x32xbf16>
      %cst_64 = arith.constant dense<0.000000e+00> : vector<8x32xf32>
      %128 = tpu.matmul %121, %127, %cst_64 {dimension_numbers = #tpu.dot_dimension_numbers<[1], [0], [0], [1], [0, 0, 1, 1], [], []>} : vector<8x32xbf16>, vector<32x32xbf16>, vector<8x32xf32> -> vector<8x32xf32>
      %c0_65 = arith.constant 0 : index
      %c0_66 = arith.constant 0 : index
      %129 = vector.load %arg8[%c0_65, %c0_66] : memref<1x32xf32, #tpu.memory_space<vmem>>, vector<1x32xf32>
      %130 = vector.broadcast %129 : vector<1x32xf32> to vector<8x32xf32>
      %131 = arith.addf %128, %130 : vector<8x32xf32>
      %132 = arith.truncf %126 : vector<8x32xf32> to vector<8x32xbf16>
      %c0_67 = arith.constant 0 : index
      %c0_68 = arith.constant 0 : index
      %133 = vector.load %arg20[%c0_67, %c0_68] : memref<8x32xbf16, #tpu.memory_space<vmem>>, vector<8x32xbf16>
      tpu.vector_store %arg20[%c0_67, %c0_68], %132 {strides = array<i32>} : memref<8x32xbf16, #tpu.memory_space<vmem>>, vector<8x32xbf16>,
      %134 = arith.truncf %131 : vector<8x32xf32> to vector<8x32xbf16>
      %c0_69 = arith.constant 0 : index
      %c0_70 = arith.constant 0 : index
      %135 = vector.load %arg21[%c0_69, %c0_70] : memref<8x32xbf16, #tpu.memory_space<vmem>>, vector<8x32xbf16>
      tpu.vector_store %arg21[%c0_69, %c0_70], %134 {strides = array<i32>} : memref<8x32xbf16, #tpu.memory_space<vmem>>, vector<8x32xbf16>,
    } else {
    }
    %c8_i32 = arith.constant 8 : i32
    %3 = arith.muli %arg1, %c8_i32 : i32
    %4 = tpu.assume_multiple %3, 8 : i32
    %c0 = arith.constant 0 : index
    %5 = arith.index_cast %4 : i32 to index
    %c0_1 = arith.constant 0 : index
    %6 = vector.load %arg2[%c0, %5, %c0_1] : memref<1x8x32xf32, #tpu.memory_space<vmem>>, vector<1x8x32xf32>
    %7 = vector.shape_cast %6 : vector<1x8x32xf32> to vector<8x32xf32>
    %8 = arith.truncf %7 : vector<8x32xf32> to vector<8x32xbf16>
    %c0_2 = arith.constant 0 : index
    %c0_3 = arith.constant 0 : index
    %9 = vector.load %arg3[%c0_2, %c0_3] : memref<32x32xbf16, #tpu.memory_space<vmem>>, vector<32x32xbf16>
    %cst = arith.constant dense<0.000000e+00> : vector<8x32xf32>
    %10 = tpu.matmul %8, %9, %cst {dimension_numbers = #tpu.dot_dimension_numbers<[1], [0], [0], [1], [0, 0, 1, 1], [], []>} : vector<8x32xbf16>, vector<32x32xbf16>, vector<8x32xf32> -> vector<8x32xf32>
    %c0_4 = arith.constant 0 : index
    %c0_5 = arith.constant 0 : index
    %11 = vector.load %arg6[%c0_4, %c0_5] : memref<1x32xf32, #tpu.memory_space<vmem>>, vector<1x32xf32>
    %12 = vector.broadcast %11 : vector<1x32xf32> to vector<8x32xf32>
    %13 = arith.addf %10, %12 : vector<8x32xf32>
    %14 = vector.shape_cast %13 : vector<8x32xf32> to vector<8x4x8xf32>
    %15 = arith.truncf %14 : vector<8x4x8xf32> to vector<8x4x8xbf16>
    %cst_6 = arith.constant -1.000000e+30 : f32
    %16 = vector.broadcast %cst_6 : f32 to vector<4x8x1xf32>
    %cst_7 = arith.constant 0.000000e+00 : f32
    %17 = vector.broadcast %cst_7 : f32 to vector<4x8x1xf32>
    %cst_8 = arith.constant 0.000000e+00 : f32
    %18 = vector.broadcast %cst_8 : f32 to vector<4x8x8xf32>
    %c0_9 = arith.constant 0 : index
    %c0_10 = arith.constant 0 : index
    %19 = vector.load %arg20[%c0_9, %c0_10] : memref<8x32xbf16, #tpu.memory_space<vmem>>, vector<8x32xbf16>
    %20 = vector.shape_cast %19 : vector<8x32xbf16> to vector<8x4x8xbf16>
    %c0_11 = arith.constant 0 : index
    %c0_12 = arith.constant 0 : index
    %21 = vector.load %arg21[%c0_11, %c0_12] : memref<8x32xbf16, #tpu.memory_space<vmem>>, vector<8x32xbf16>
    %22 = vector.shape_cast %21 : vector<8x32xbf16> to vector<8x4x8xbf16>
    "tpu.trace_start"() <{level = 10 : i32, message = "qhd,khd->hqk"}> : () -> ()
    %cst_13 = arith.constant dense<0.000000e+00> : vector<4x8x8xf32>
    %23 = tpu.matmul %15, %20, %cst_13 {dimension_numbers = #tpu.dot_dimension_numbers<[2], [2], [0], [0], [0, 1, 0, 0, 1, 0], [1], [1]>} : vector<8x4x8xbf16>, vector<8x4x8xbf16>, vector<4x8x8xf32> -> vector<4x8x8xf32>
    "tpu.trace_stop"() : () -> ()
    %cst_14 = arith.constant dense<0xFF800000> : vector<4x8xf32>
    %24 = vector.multi_reduction <maximumf>, %23, %cst_14 [2] : vector<4x8x8xf32> to vector<4x8xf32>
    %25 = vector.shape_cast %24 : vector<4x8xf32> to vector<4x8x1xf32>
    %26 = arith.maximumf %16, %25 : vector<4x8x1xf32>
    %27 = arith.subf %16, %26 : vector<4x8x1xf32>
    %28 = math.exp %27 : vector<4x8x1xf32>
    %29 = vector.broadcast %26 : vector<4x8x1xf32> to vector<4x8x8xf32>
    %30 = arith.subf %23, %29 : vector<4x8x8xf32>
    %31 = math.exp %30 : vector<4x8x8xf32>
    %32 = arith.mulf %28, %17 : vector<4x8x1xf32>
    %cst_15 = arith.constant dense<0.000000e+00> : vector<4x8xf32>
    %33 = vector.multi_reduction <add>, %31, %cst_15 [2] : vector<4x8x8xf32> to vector<4x8xf32>
    %34 = vector.shape_cast %33 : vector<4x8xf32> to vector<4x8x1xf32>
    %35 = arith.addf %32, %34 : vector<4x8x1xf32>
    %36 = arith.truncf %31 : vector<4x8x8xf32> to vector<4x8x8xbf16>
    "tpu.trace_start"() <{level = 10 : i32, message = "hqk,khd->hqd"}> : () -> ()
    %cst_16 = arith.constant dense<0.000000e+00> : vector<4x8x8xf32>
    %37 = tpu.matmul %36, %22, %cst_16 {dimension_numbers = #tpu.dot_dimension_numbers<[2], [0], [1], [2], [0, 0, 0, 1, 1, 2], [0], [1]>} : vector<4x8x8xbf16>, vector<8x4x8xbf16>, vector<4x8x8xf32> -> vector<4x8x8xf32>
    "tpu.trace_stop"() : () -> ()
    %38 = vector.broadcast %28 : vector<4x8x1xf32> to vector<4x8x8xf32>
    %39 = arith.mulf %38, %18 : vector<4x8x8xf32>
    %40 = arith.addf %39, %37 : vector<4x8x8xf32>
    %41 = tpu.reciprocal %35 {approx = true} : vector<4x8x1xf32> -> vector<4x8x1xf32>
    %42 = vector.broadcast %41 : vector<4x8x1xf32> to vector<4x8x8xf32>
    %43 = arith.mulf %40, %42 : vector<4x8x8xf32>
    %44 = tpu.transpose %43, [1, 0, 2] : vector<4x8x8xf32> -> vector<8x4x8xf32>
    %45 = vector.shape_cast %44 : vector<8x4x8xf32> to vector<8x32xf32>
    %46 = arith.truncf %45 : vector<8x32xf32> to vector<8x32xbf16>
    %c0_17 = arith.constant 0 : index
    %c0_18 = arith.constant 0 : index
    %47 = vector.load %arg9[%c0_17, %c0_18] : memref<32x32xbf16, #tpu.memory_space<vmem>>, vector<32x32xbf16>
    %cst_19 = arith.constant dense<0.000000e+00> : vector<8x32xf32>
    %48 = tpu.matmul %46, %47, %cst_19 {dimension_numbers = #tpu.dot_dimension_numbers<[1], [0], [0], [1], [0, 0, 1, 1], [], []>} : vector<8x32xbf16>, vector<32x32xbf16>, vector<8x32xf32> -> vector<8x32xf32>
    %c0_20 = arith.constant 0 : index
    %c0_21 = arith.constant 0 : index
    %49 = vector.load %arg10[%c0_20, %c0_21] : memref<1x32xf32, #tpu.memory_space<vmem>>, vector<1x32xf32>
    %50 = vector.broadcast %49 : vector<1x32xf32> to vector<8x32xf32>
    %51 = arith.addf %48, %50 : vector<8x32xf32>
    %52 = arith.addf %7, %51 : vector<8x32xf32>
    %c0_22 = arith.constant 0 : index
    %c0_23 = arith.constant 0 : index
    %53 = vector.load %arg11[%c0_22, %c0_23] : memref<1x32xf32, #tpu.memory_space<vmem>>, vector<1x32xf32>
    %c0_24 = arith.constant 0 : index
    %c0_25 = arith.constant 0 : index
    %54 = vector.load %arg12[%c0_24, %c0_25] : memref<1x32xf32, #tpu.memory_space<vmem>>, vector<1x32xf32>
    %cst_26 = arith.constant dense<0.000000e+00> : vector<8xf32>
    %55 = vector.multi_reduction <add>, %52, %cst_26 [1] : vector<8x32xf32> to vector<8xf32>
    %56 = vector.shape_cast %55 : vector<8xf32> to vector<8x1xf32>
    %cst_27 = arith.constant 3.200000e+01 : f32
    %57 = vector.broadcast %cst_27 : f32 to vector<8x1xf32>
    %58 = arith.divf %56, %57 : vector<8x1xf32>
    %59 = vector.broadcast %58 : vector<8x1xf32> to vector<8x32xf32>
    %60 = arith.subf %52, %59 : vector<8x32xf32>
    %61 = arith.mulf %60, %60 : vector<8x32xf32>
    %cst_28 = arith.constant dense<0.000000e+00> : vector<8xf32>
    %62 = vector.multi_reduction <add>, %61, %cst_28 [1] : vector<8x32xf32> to vector<8xf32>
    %63 = vector.shape_cast %62 : vector<8xf32> to vector<8x1xf32>
    %cst_29 = arith.constant 3.200000e+01 : f32
    %64 = vector.broadcast %cst_29 : f32 to vector<8x1xf32>
    %65 = arith.divf %63, %64 : vector<8x1xf32>
    %66 = vector.broadcast %58 : vector<8x1xf32> to vector<8x32xf32>
    %67 = arith.subf %52, %66 : vector<8x32xf32>
    %cst_30 = arith.constant 9.99999974E-6 : f32
    %68 = vector.broadcast %cst_30 : f32 to vector<8x1xf32>
    %69 = arith.addf %65, %68 : vector<8x1xf32>
    %70 = math.rsqrt %69 : vector<8x1xf32>
    %71 = vector.broadcast %70 : vector<8x1xf32> to vector<8x32xf32>
    %72 = arith.mulf %67, %71 : vector<8x32xf32>
    %73 = vector.broadcast %53 : vector<1x32xf32> to vector<8x32xf32>
    %74 = arith.mulf %72, %73 : vector<8x32xf32>
    %75 = vector.broadcast %54 : vector<1x32xf32> to vector<8x32xf32>
    %76 = arith.addf %74, %75 : vector<8x32xf32>
    %77 = arith.truncf %76 : vector<8x32xf32> to vector<8x32xbf16>
    %c0_31 = arith.constant 0 : index
    %c0_32 = arith.constant 0 : index
    %78 = vector.load %arg13[%c0_31, %c0_32] : memref<32x64xbf16, #tpu.memory_space<vmem>>, vector<32x64xbf16>
    %cst_33 = arith.constant dense<0.000000e+00> : vector<8x64xf32>
    %79 = tpu.matmul %77, %78, %cst_33 {dimension_numbers = #tpu.dot_dimension_numbers<[1], [0], [0], [1], [0, 0, 1, 1], [], []>} : vector<8x32xbf16>, vector<32x64xbf16>, vector<8x64xf32> -> vector<8x64xf32>
    %c0_34 = arith.constant 0 : index
    %c0_35 = arith.constant 0 : index
    %80 = vector.load %arg14[%c0_34, %c0_35] : memref<1x64xf32, #tpu.memory_space<vmem>>, vector<1x64xf32>
    %81 = vector.broadcast %80 : vector<1x64xf32> to vector<8x64xf32>
    %82 = arith.addf %79, %81 : vector<8x64xf32>
    %cst_36 = arith.constant 0.000000e+00 : f32
    %83 = vector.broadcast %cst_36 : f32 to vector<8x64xf32>
    %84 = arith.maximumf %82, %83 : vector<8x64xf32>
    %85 = arith.truncf %84 : vector<8x64xf32> to vector<8x64xbf16>
    %c0_37 = arith.constant 0 : index
    %c0_38 = arith.constant 0 : index
    %86 = vector.load %arg15[%c0_37, %c0_38] : memref<64x32xbf16, #tpu.memory_space<vmem>>, vector<64x32xbf16>
    %cst_39 = arith.constant dense<0.000000e+00> : vector<8x32xf32>
    %87 = tpu.matmul %85, %86, %cst_39 {dimension_numbers = #tpu.dot_dimension_numbers<[1], [0], [0], [1], [0, 0, 1, 1], [], []>} : vector<8x64xbf16>, vector<64x32xbf16>, vector<8x32xf32> -> vector<8x32xf32>
    %c0_40 = arith.constant 0 : index
    %c0_41 = arith.constant 0 : index
    %88 = vector.load %arg16[%c0_40, %c0_41] : memref<1x32xf32, #tpu.memory_space<vmem>>, vector<1x32xf32>
    %89 = vector.broadcast %88 : vector<1x32xf32> to vector<8x32xf32>
    %90 = arith.addf %87, %89 : vector<8x32xf32>
    %91 = arith.addf %76, %90 : vector<8x32xf32>
    %c0_42 = arith.constant 0 : index
    %c0_43 = arith.constant 0 : index
    %92 = vector.load %arg17[%c0_42, %c0_43] : memref<1x32xf32, #tpu.memory_space<vmem>>, vector<1x32xf32>
    %c0_44 = arith.constant 0 : index
    %c0_45 = arith.constant 0 : index
    %93 = vector.load %arg18[%c0_44, %c0_45] : memref<1x32xf32, #tpu.memory_space<vmem>>, vector<1x32xf32>
    %cst_46 = arith.constant dense<0.000000e+00> : vector<8xf32>
    %94 = vector.multi_reduction <add>, %91, %cst_46 [1] : vector<8x32xf32> to vector<8xf32>
    %95 = vector.shape_cast %94 : vector<8xf32> to vector<8x1xf32>
    %cst_47 = arith.constant 3.200000e+01 : f32
    %96 = vector.broadcast %cst_47 : f32 to vector<8x1xf32>
    %97 = arith.divf %95, %96 : vector<8x1xf32>
    %98 = vector.broadcast %97 : vector<8x1xf32> to vector<8x32xf32>
    %99 = arith.subf %91, %98 : vector<8x32xf32>
    %100 = arith.mulf %99, %99 : vector<8x32xf32>
    %cst_48 = arith.constant dense<0.000000e+00> : vector<8xf32>
    %101 = vector.multi_reduction <add>, %100, %cst_48 [1] : vector<8x32xf32> to vector<8xf32>
    %102 = vector.shape_cast %101 : vector<8xf32> to vector<8x1xf32>
    %cst_49 = arith.constant 3.200000e+01 : f32
    %103 = vector.broadcast %cst_49 : f32 to vector<8x1xf32>
    %104 = arith.divf %102, %103 : vector<8x1xf32>
    %105 = vector.broadcast %97 : vector<8x1xf32> to vector<8x32xf32>
    %106 = arith.subf %91, %105 : vector<8x32xf32>
    %cst_50 = arith.constant 9.99999974E-6 : f32
    %107 = vector.broadcast %cst_50 : f32 to vector<8x1xf32>
    %108 = arith.addf %104, %107 : vector<8x1xf32>
    %109 = math.rsqrt %108 : vector<8x1xf32>
    %110 = vector.broadcast %109 : vector<8x1xf32> to vector<8x32xf32>
    %111 = arith.mulf %106, %110 : vector<8x32xf32>
    %112 = vector.broadcast %92 : vector<1x32xf32> to vector<8x32xf32>
    %113 = arith.mulf %111, %112 : vector<8x32xf32>
    %114 = vector.broadcast %93 : vector<1x32xf32> to vector<8x32xf32>
    %115 = arith.addf %113, %114 : vector<8x32xf32>
    %c0_51 = arith.constant 0 : index
    %c0_52 = arith.constant 0 : index
    %c0_53 = arith.constant 0 : index
    %116 = vector.load %arg19[%c0_51, %c0_52, %c0_53] : memref<1x8x32xf32, #tpu.memory_space<vmem>>, vector<1x8x32xf32>
    %117 = vector.shape_cast %116 : vector<1x8x32xf32> to vector<8x32xf32>
    %118 = vector.shape_cast %115 : vector<8x32xf32> to vector<1x8x32xf32>
    tpu.vector_store %arg19[%c0_51, %c0_52, %c0_53], %118 {strides = array<i32>} : memref<1x8x32xf32, #tpu.memory_space<vmem>>, vector<1x8x32xf32>,
    return
  }
  func.func @transform_0(%arg0: i32, %arg1: i32) -> (i32, i32, i32) {
    %c0_i32 = arith.constant 0 : i32
    %c0_i32_0 = arith.constant 0 : i32
    %c0_i32_1 = arith.constant 0 : i32
    return %arg0, %c0_i32, %c0_i32_0 : i32, i32, i32
  }
  func.func @transform_1(%arg0: i32, %arg1: i32) -> (i32, i32) {
    %c0_i32 = arith.constant 0 : i32
    %c0_i32_0 = arith.constant 0 : i32
    %c0_i32_1 = arith.constant 0 : i32
    return %c0_i32, %c0_i32_0 : i32, i32
  }
  func.func @transform_2(%arg0: i32, %arg1: i32) -> (i32, i32) {
    %c0_i32 = arith.constant 0 : i32
    %c0_i32_0 = arith.constant 0 : i32
    %c0_i32_1 = arith.constant 0 : i32
    return %c0_i32, %c0_i32_0 : i32, i32
  }
  func.func @transform_3(%arg0: i32, %arg1: i32) -> (i32, i32) {
    %c0_i32 = arith.constant 0 : i32
    %c0_i32_0 = arith.constant 0 : i32
    %c0_i32_1 = arith.constant 0 : i32
    return %c0_i32, %c0_i32_0 : i32, i32
  }
  func.func @transform_4(%arg0: i32, %arg1: i32) -> (i32, i32) {
    %c0_i32 = arith.constant 0 : i32
    %c0_i32_0 = arith.constant 0 : i32
    %c0_i32_1 = arith.constant 0 : i32
    return %c0_i32, %c0_i32_0 : i32, i32
  }
  func.func @transform_5(%arg0: i32, %arg1: i32) -> (i32, i32) {
    %c0_i32 = arith.constant 0 : i32
    %c0_i32_0 = arith.constant 0 : i32
    %c0_i32_1 = arith.constant 0 : i32
    return %c0_i32, %c0_i32_0 : i32, i32
  }
  func.func @transform_6(%arg0: i32, %arg1: i32) -> (i32, i32) {
    %c0_i32 = arith.constant 0 : i32
    %c0_i32_0 = arith.constant 0 : i32
    %c0_i32_1 = arith.constant 0 : i32
    return %c0_i32, %c0_i32_0 : i32, i32
  }
  func.func @transform_7(%arg0: i32, %arg1: i32) -> (i32, i32) {
    %c0_i32 = arith.constant 0 : i32
    %c0_i32_0 = arith.constant 0 : i32
    %c0_i32_1 = arith.constant 0 : i32
    return %c0_i32, %c0_i32_0 : i32, i32
  }
  func.func @transform_8(%arg0: i32, %arg1: i32) -> (i32, i32) {
    %c0_i32 = arith.constant 0 : i32
    %c0_i32_0 = arith.constant 0 : i32
    %c0_i32_1 = arith.constant 0 : i32
    return %c0_i32, %c0_i32_0 : i32, i32
  }
  func.func @transform_9(%arg0: i32, %arg1: i32) -> (i32, i32) {
    %c0_i32 = arith.constant 0 : i32
    %c0_i32_0 = arith.constant 0 : i32
    %c0_i32_1 = arith.constant 0 : i32
    return %c0_i32, %c0_i32_0 : i32, i32
  }
  func.func @transform_10(%arg0: i32, %arg1: i32) -> (i32, i32) {
    %c0_i32 = arith.constant 0 : i32
    %c0_i32_0 = arith.constant 0 : i32
    %c0_i32_1 = arith.constant 0 : i32
    return %c0_i32, %c0_i32_0 : i32, i32
  }
  func.func @transform_11(%arg0: i32, %arg1: i32) -> (i32, i32) {
    %c0_i32 = arith.constant 0 : i32
    %c0_i32_0 = arith.constant 0 : i32
    %c0_i32_1 = arith.constant 0 : i32
    return %c0_i32, %c0_i32_0 : i32, i32
  }
  func.func @transform_12(%arg0: i32, %arg1: i32) -> (i32, i32) {
    %c0_i32 = arith.constant 0 : i32
    %c0_i32_0 = arith.constant 0 : i32
    %c0_i32_1 = arith.constant 0 : i32
    return %c0_i32, %c0_i32_0 : i32, i32
  }
  func.func @transform_13(%arg0: i32, %arg1: i32) -> (i32, i32) {
    %c0_i32 = arith.constant 0 : i32
    %c0_i32_0 = arith.constant 0 : i32
    %c0_i32_1 = arith.constant 0 : i32
    return %c0_i32, %c0_i32_0 : i32, i32
  }
  func.func @transform_14(%arg0: i32, %arg1: i32) -> (i32, i32) {
    %c0_i32 = arith.constant 0 : i32
    %c0_i32_0 = arith.constant 0 : i32
    %c0_i32_1 = arith.constant 0 : i32
    return %c0_i32, %c0_i32_0 : i32, i32
  }
  func.func @transform_15(%arg0: i32, %arg1: i32) -> (i32, i32) {
    %c0_i32 = arith.constant 0 : i32
    %c0_i32_0 = arith.constant 0 : i32
    %c0_i32_1 = arith.constant 0 : i32
    return %c0_i32, %c0_i32_0 : i32, i32
  }
  func.func @transform_16(%arg0: i32, %arg1: i32) -> (i32, i32) {
    %c0_i32 = arith.constant 0 : i32
    %c0_i32_0 = arith.constant 0 : i32
    %c0_i32_1 = arith.constant 0 : i32
    return %c0_i32, %c0_i32_0 : i32, i32
  }
  func.func @transform_17(%arg0: i32, %arg1: i32) -> (i32, i32, i32) {
    %c0_i32 = arith.constant 0 : i32
    %c0_i32_0 = arith.constant 0 : i32
    return %arg0, %arg1, %c0_i32 : i32, i32, i32
  }
}

</mosaic_0001>

<bundles_post_ra>
// kernel: tpu_custom_call.1
= control target key start
LH: loop header
LB: loop body
LE: loop exit
PB: predicated region body
PF: predicated region fallthrough
CT: control target
= control target key end

     0   :  { %s2995_s0 = inlined_call_operand.vmem [shape: f32[2,8,32], index: 0, kind: input, shape index: {}]   ;;  %s2996_s1 = inlined_call_operand.vmem [shape: bf16[32,32], index: 1, kind: input, shape index: {}]   ;;  %s2997_s2 = inlined_call_operand.vmem [shape: bf16[32,32], index: 2, kind: input, shape index: {}]   ;;  %s2998_s3 = inlined_call_operand.hbm [shape: bf16[32,32], index: 3, kind: input, shape index: {}]   ;;  %s2999_s4 = inlined_call_operand.vmem [shape: f32[1,32], index: 4, kind: input, shape index: {}]   ;;  %s3000_s5 = inlined_call_operand.vmem [shape: f32[1,32], index: 5, kind: input, shape index: {}]   ;;  %s3001_s6 = inlined_call_operand.vmem [shape: f32[1,32], index: 6, kind: input, shape index: {}]   ;;  %s3002_s7 = inlined_call_operand.hbm [shape: bf16[32,32], index: 7, kind: input, shape index: {}]   ;;  %s3003_s8 = inlined_call_operand.vmem [shape: f32[1,32], index: 8, kind: input, shape index: {}]   ;;  %s3004_s9 = inlined_call_operand.vmem [shape: f32[1,32], index: 9, kind: input, shape index: {}]   ;;  %s3005_s10 = inlined_call_operand.vmem [shape: f32[1,32], index: 10, kind: input, shape index: {}]   ;;  %s3006_s11 = inlined_call_operand.hbm [shape: bf16[32,64], index: 11, kind: input, shape index: {}]   ;;  %s3007_s12 = inlined_call_operand.vmem [shape: f32[1,64], index: 12, kind: input, shape index: {}]   ;;  %s3008_s13 = inlined_call_operand.vmem [shape: bf16[64,32], index: 13, kind: input, shape index: {}]   ;;  %s3009_s14 = inlined_call_operand.vmem [shape: f32[1,32], index: 14, kind: input, shape index: {}]   ;;  %s3010_s15 = inlined_call_operand.vmem [shape: f32[1,32], index: 15, kind: input, shape index: {}]   ;;  %s3011_s16 = inlined_call_operand.vmem [shape: f32[1,32], index: 16, kind: input, shape index: {}]   ;;  %s3012_s17 = inlined_call_operand.hbm [shape: f32[2,8,32], index: 17, kind: output, shape index: {}]  }
   0x1   :  { %3021 = sst [smem:[#allocation21_spill]] %s2995_s0 }
   0x2   :  { %3022 = sst [smem:[#allocation22_spill]] %s2996_s1 }
   0x3   :  { %3023 = sst [smem:[#allocation23_spill]] %s2997_s2 }
   0x4   :  { %3024 = sst [smem:[#allocation24_spill]] %s2998_s3 }
   0x5   :  { %22 = vsyncpa [#allocation5], 0 }
   0x6   :  { %23 = vsyncpa [#allocation8], 0 }
   0x7   :  { %24 = vsyncpa [#allocation6], 0 }
   0x8   :  { %26 = vsyncpa [#allocation6 + $0x1], 0  ;;  %s2651_s24 = smov 0   ;;  %s2653_s25 = smov 0  }
   0x9   :  { %s2655_s26 = smov 0   ;;  %s2657_s27 = smov 0  }
   0xa   :  { %s2659_s28 = smov 0   ;;  %s2661_s29 = smov 0  }
   0xb LB: > { %3025 = sst [smem:[#allocation14_spill]] %s2522_s24  ;;  %s2042_s0 = sadd.s32 4294967295, %s2542_s29   ;;  %s2542_s29 = sphi %s2661_s29, %s32_s29   ;;  %s2538_s28 = sphi %s2659_s28, %s3049_s28   ;;  %s2534_s27 = sphi %s2657_s27, %s3048_s27   ;;  %s2530_s26 = sphi %s2655_s26, %s3047_s26   ;;  %s2526_s25 = sphi %s2653_s25, %s3051_s25   ;;  %s2522_s24 = sphi %s2651_s24, %s3050_s24  }
   0xc   : > { %3026 = sst [smem:[#allocation15_spill]] %s2530_s26  ;;  %s2043_s30 = sadd.s32 4294967294, %s2542_s29  }
   0xd   : > { %3027 = sst [smem:[#allocation16_spill]] %s2538_s28  ;;  %s44_s18 = sadd.s32 1, %s2538_s28 }
   0xe   : > { %3028 = sst [smem:[#allocation17_spill]] %s2542_s29  ;;  %s415_s19 = sadd.s32 1, %s2530_s26 }
   0xf   : > { %p46_p0 = scmp.ge.s32.totalorder %s44_s18, 2  ;;  %p425_p1 = scmp.ne.s32.totalorder %s2530_s26, %s2526_s25 }
  0x10   : > { %p426_p2 = scmp.eq.s32.totalorder %s2042_s0, 1  ;;  %p431_p3 = scmp.ne.s32.totalorder %s2526_s25, %s2522_s24 }
  0x11   : > { %s3053_s18 = smov (%p46_p0, %s44_s18), 0  ;;  %p432_p5 = scmp.eq.s32.totalorder %s2043_s30, 1 }
  0x12   : > { %3029 = sst [smem:[#allocation18_spill]] %s3053_s18  ;;  %p2691_p4 = por %p426_p2, %p425_p1 }
  0x13   : > { %s410_s20 = ssub.s32 %s2538_s28, %s3053_s18  ;;  %p2044_p6 = scmp.ge.s32.totalorder %s2542_s29, 1 }
  0x14   : > { %p413_p7 = scmp.eq.s32.totalorder %s410_s20, 0  ;;  %p2698_p8 = por %p432_p5, %p431_p3 }
  0x15   : > { %p439_p9 = scmp.lt.s32.totalorder %s2542_s29, 3  ;;  %p2710_p11 = scmp.eq.s32.totalorder %s2042_s0, 0 }
  0x16   : > { %s3031_s21 = scalar_select %p2698_p8, 1, 0 }
  0x17   : > { %s2704_s22 = scalar_select %p413_p7, %s2530_s26, %s415_s19  }
  0x18   : > { %3032 = sst [smem:[#allocation19_spill]] %s3031_s21  ;;  %p2706_p10 = pnand %p2044_p6, %p439_p9 }
  0x19   : > { %3033 = sst [smem:[#allocation20_spill]] %s2704_s22  ;;  %s2544_s30 = smov [#allocation7]  }
  0x1a   : > { %p2253_p12 = pneg %p2706_p10  ;;  %s479_s20 = sshll.u32 %s2544_s30, 4  ;;  %s480_s20 = int_to_ptr.vmem [resolvable:$true] %s479_s20 }
  0x1b   : > { %s2545_s19 = smov [#allocation4]   ;;  %s2391_s0 = scalar_lea.vmem %s480_s20, 256 }
  0x1c   : > { %p2718_p13 = pnand %p2710_p11, %p2253_p12  ;;  %s457_s28 = sshll.u32 %s2545_s19, 4  ;;  %s458_s28 = int_to_ptr.vmem [resolvable:$true] %s457_s28 }
  0x1d   : > { %p2392_p1 = scmp.ne.s32.totalorder %s480_s20, %s2391_s0  ;;  %p2399_p5 = scmp.lt.s32.totalorder %s480_s20, %s480_s20 }
  0x1e   : > { %p2382_p0 = pneg %p2718_p13  ;;  %p2400_p6 = scmp.lt.s32.totalorder %s2391_s0, %s2391_s0 }
  0x20   : > { %p2394_p2 = pnand %p2392_p1, %p2382_p0  ;;  %p2401_p7 = por %p2400_p6, %p2399_p5 }
  0x22   : > { %p2395_p3 = pneg %p2394_p2 }
  0x24   : > { %p2402_p9 = pnand %p2401_p7, %p2395_p3 }
  0x26   : > { %2405 = shalt.err (!%p2402_p9)
}
  0x27   : > { %s2546_s30 = smov 64   ;;  %s2547_s22 = smov 4  }
  0x28   : > { %2259 = dma.hbm_to_vmem [thread:$0]  (!%p2718_p13), %s3002_s7, 256, %s480_s20, [#allocation8], %s2546_s30, %s2546_s30, %s2547_s22  }
  0x29   : > { %s2417_s21 = scalar_lea.vmem %s458_s28, 256  ;;  %p2425_p8 = scmp.lt.s32.totalorder %s458_s28, %s458_s28 }
  0x2a   : > { %p2418_p12 = scmp.ne.s32.totalorder %s458_s28, %s2417_s21  ;;  %p2426_p5 = scmp.lt.s32.totalorder %s2417_s21, %s2417_s21 }
  0x2c   : > { %p2420_p1 = pnand %p2418_p12, %p2382_p0  ;;  %p2427_p3 = por %p2426_p5, %p2425_p8 }
  0x2e   : > { %p2421_p2 = pneg %p2420_p1 }
  0x30   : > { %p2428_p6 = pnand %p2427_p3, %p2421_p2 }
  0x32   : > { %2431 = shalt.err (!%p2428_p6)
}
  0x33   : > { %s3037_s3 = sld [smem:[#allocation24_spill]]  ;;  %s2548_s26 = smov [#allocation9]  }
  0x34   : > { %s501_s20 = sshll.u32 %s2548_s26, 4  ;;  %s502_s20 = int_to_ptr.vmem [resolvable:$true] %s501_s20 }
  0x35   : > { %s2443_s19 = scalar_lea.vmem %s502_s20, 256  ;;  %p2451_p1 = scmp.lt.s32.totalorder %s502_s20, %s502_s20 }
  0x36   : > { %p2444_p7 = scmp.ne.s32.totalorder %s502_s20, %s2443_s19  ;;  %p2452_p8 = scmp.lt.s32.totalorder %s2443_s19, %s2443_s19 }
  0x38   : > { %p2446_p9 = pnand %p2444_p7, %p2382_p0  ;;  %p2453_p2 = por %p2452_p8, %p2451_p1 }
  0x39   : > { %2256 = dma.hbm_to_vmem [thread:$0]  (!%p2718_p13), %s3037_s3, 256, %s458_s28, [#allocation5], %s2546_s30, %s2546_s30, %s2547_s22  }
  0x3a   : > { %p2447_p12 = pneg %p2446_p9 }
  0x3c   : > { %p2454_p5 = pnand %p2453_p2, %p2447_p12 }
  0x3e   : > { %2457 = shalt.err (!%p2454_p5)
}
  0x3f   : > { %2262 = dma.hbm_to_vmem [thread:$0]  (!%p2718_p13), %s3006_s11, 256, %s502_s20, [#allocation8], %s2546_s30, %s2546_s30, %s2547_s22  }
  0x40   : > { %539 = sbr.rel (%p2706_p10) target bundleno = 2433 (0x981), region = 88 }
  0x45   : > { %2509 = dma.done.wait (%p2710_p11), [#allocation5], 256  }
  0x46   : > { %2511 = vsyncadd (%p2710_p11), [#allocation5], 4294967040 }
  0x47   : > { %2513 = dma.done.wait (%p2710_p11), [#allocation8], 512  }
  0x48   : > { %2515 = vsyncadd (%p2710_p11), [#allocation8], 4294966784  ;;  %p598_p0 = scmp.lt.s32.totalorder %s2534_s27, 1  ;;  %v2549_v0 = vmov 0.0   ;;  %vm2550_vm0 = vmmov 0   ;;  %s3038_s23 = sld [smem:[#allocation21_spill]]  ;;  %v830_v25 = vlaneseq }
  0x49   : > { %2139 = vmatprep.subr.bf16.mxu0 %v2549_v0  ;;  %2143 = vmatprep.mubr.msk.bf16.mxu0 %vm2550_vm0, %v2549_v0  ;;  %s3039_s2 = sld [smem:[#allocation23_spill]]  ;;  %vm632_vm1 = vcmask 261120   ;;  %v2055_v7 = vld [vmem:[%s3000_s5] ss:$0 sm:$0xff]  ;;  %vm740_vm2 = vcmask 257024   ;;  %v2342_v19 = vld [vmem:[#allocation4 + $0x8] sm:$0xff]  }
  0x4a   : > { %s599_s28 = scalar_select %p598_p0, %s2534_s27, 1  ;;  %2147 = vmatprep.subr.bf16.mxu1 %v2549_v0  ;;  %2151 = vmatprep.mubr.msk.bf16.mxu1 %vm2550_vm0, %v2549_v0  ;;  %v2063_v15 = vld [vmem:[%s2999_s4] ss:$0 sm:$0xff]  ;;  %v2343_v22 = vld [vmem:[#allocation4] sm:$0xff]   ;;  %v2554_v23 = vmov 1983009808  }
  0x4b   : > { %s2551_s26 = smov 104   ;;  %s2552_s20 = smov 120   ;;  %2148 = vmatpush3.bf16.msra.mxu1 %v2342_v19  ;;  %v828_v24 = vunpack.c.l.s4 %v2554_v23  ;;  %v2555_v28 = vmov 1934713408   ;;  %v831_v31 = vshrl.u32 %v830_v25, 7  ;;  %vm1050_vm3 = vcmask 1043456  }
  0x4c   : > { %s2054_s18 = sshll.u32 %s599_s28, 3  ;;  %s3040_s28 = sld [smem:[#allocation22_spill]]  ;;  %2149 = vmatprep.subr.bf16.mxu1 %v2549_v0  ;;  %v860_v29 = vunpack.c.l.s4 %v2555_v28  ;;  %vm1046_vm4 = vcmask 64512   ;;  %vm1641_vm5 = vcmask 130048   ;;  %vm1643_vm6 = vcmask 195584  }
  0x4d   : > { %s2553_s19 = smov 112   ;;  %v829_v30 = vunpack.c.0.s8 %v828_v24  ;;  %s2559_s22 = smov 24   ;;  %vm1851_vm7 = vcmask 523264  }
  0x4e   : > { %s601_s30 = scalar_lea.vmem %s3038_s23, %s2054_s18  ;;  %v861_v34 = vunpack.c.0.s8 %v860_v29  ;;  %s2558_s18 = smov 8  }
  0x4f   : > { %v2338_v1 = vld [vmem:[%s3039_s2 + $0x8] sm:$0xff]   ;;  %v2339_v2 = vld [vmem:[%s3039_s2] sm:$0xff]   ;;  %2150 = vmatpush3.bf16.msra.mxu1 %v2343_v22  ;;  %v2813_v35 = vsub.s32 %v829_v30, %v831_v31  ;;  %s2100_s24 = sshll.u32 %s2534_s27, 7 }
  0x50   : > { %2140 = vmatpush3.bf16.msra.mxu0 %v2338_v1  ;;  %v2775_v3 = vld [vmem:[%s601_s30] sm:$0xff]  ;;  %2163 = vmatprep.subr.bf16.mxu1 %v2549_v0  ;;  %v2815_v42 = vsub.s32 %v861_v34, %v831_v31 }
  0x51   : > { %2141 = vmatprep.subr.bf16.mxu0 %v2549_v0  ;;  %v608_v5 = vpack.c.bf16 %v2775_v3, %v2775_v3  ;;  %v2059_v22 = vld [vmem:[%s3001_s6] ss:$0 sm:$0xff] }
  0x52   : > { %s3041_s3 = smov %s3040_s28  ;;  %v2340_v4 = vld [vmem:[%s3040_s28 + $0x8] sm:$0xff]   ;;  %s2557_s28 = smov 16  }
  0x53   : > { %v2341_v6 = vld [vmem:[%s3041_s3] sm:$0xff]   ;;  %2152 = vmatmul.mubr.msk.bf16.vlgmr.msra.gmra.mxu1 %vm632_vm1, %v608_v5 }
  0x54   : > { %2142 = vmatpush3.bf16.msra.mxu0 %v2339_v2  ;;  %2165 = vmatprep.mubr.msk.bf16.mxu1 %vm2550_vm0, %v2549_v0 }
  0x55   : > { %2155 = vmatprep.subr.bf16.mxu0 %v2549_v0 }
  0x57   : > { %2144 = vmatmul.mubr.msk.bf16.vlgmr.msra.gmra.mxu0 %vm632_vm1, %v608_v5 }
  0x58   : > { %2156 = vmatpush3.bf16.msra.mxu0 %v2340_v4  ;;  %2159 = vmatprep.mubr.msk.bf16.mxu0 %vm2550_vm0, %v2549_v0 }
  0x59   : > { %2157 = vmatprep.subr.bf16.mxu0 %v2549_v0 }
  0x5c   : > { %2158 = vmatpush3.bf16.msra.mxu0 %v2341_v6 }
  0x5d   : > { %2169 = vmatprep.subr.bf16.mxu0 %v2549_v0 }
  0x5f   : > { %2160 = vmatmul.mubr.msk.bf16.vlgmr.msra.gmra.mxu0 %vm632_vm1, %v608_v5 }
  0x60   : > { %2171 = vmatprep.mubr.msk.bf16.mxu0 %vm2550_vm0, %v2549_v0 }
 0x113   : > { %v733_v23 = vpop.f32.mrf.mxu1 }
 0x114   : > { %v734_v24 = vadd.f32 %v2059_v22, %v733_v23 }
 0x115   : > { %v2153_v25 = vpop.f32.mrf.mxu1 }
 0x117   : > { %v670_v8 = vpop.f32.mrf.mxu0 }
 0x118   : > { %v671_v9 = vadd.f32 %v2055_v7, %v670_v8 }
 0x119   : > { %v2145_v10 = vpop.f32.mrf.mxu0 }
 0x11a   : > { %v739_v11 = vpack.c.bf16 %v671_v9, %v671_v9 }
 0x11b   : > { %v673_v12 = vpop.f32.mrf.mxu0 }
 0x11c   : > { %741 = vst.msk [vmem:[#allocation2] sm:$0xf] %vm740_vm2, %v739_v11  ;;  %v2556_v11 = vmov 0  }
 0x11d   : > { %v2146_v13 = vpop.f32.mrf.mxu0 }
 0x11f   : > { %v809_v14 = vpop.f32.mrf.mxu0 }
 0x120   : > { %v810_v20 = vadd.f32 %v2063_v15, %v809_v14 }
 0x121   : > { %v2161_v16 = vpop.f32.mrf.mxu0 }
 0x123   : > { %v901_v17 = vld [vmem:[#allocation2] sm:$0xf]  ;;  %v812_v18 = vpop.f32.mrf.mxu0 }
 0x124   : > { %909 = vrot.lane.b32.xlu1 %v901_v17, %s2551_s26  ;;  %903 = vrot.lane.b32.xlu0 %v901_v17, %s2552_s20 }
 0x125   : > { %v2162_v21 = vpop.f32.mrf.mxu0 }
 0x128   : > { %906 = vrot.lane.b32.xlu0 %v901_v17, %s2553_s19  ;;  %816 = vrot.lane.b32.xlu1 %v810_v20, %s2552_s20 }
 0x12c   : > { %819 = vrot.lane.b32.xlu0 %v810_v20, %s2553_s19  ;;  %822 = vrot.lane.b32.xlu1 %v810_v20, %s2551_s26 }
 0x14a   : > { %982 = vxpose.xlu0.c.b16.start.end [1/1] (short) (narrow) %v901_v17, 16 }
 0x196   : > { %v910_v26 = vpop.permute.xlu1 %909  ;;  %v904_v27 = vpop.permute.xlu0 %903 }
 0x197   : > { %998 = vxpose.xlu1.c.b16.start.end [1/1] (short) (narrow) %v904_v27, 16  ;;  %v736_v27 = vpop.f32.mrf.mxu1 }
 0x199   : > { %v2154_v28 = vpop.f32.mrf.mxu1 }
 0x19a   : > { %v907_v32 = vpop.permute.xlu0 %906  ;;  %v817_v33 = vpop.permute.xlu1 %816 }
 0x19b   : > { %1014 = vxpose.xlu0.c.b16.start.end [1/1] (short) (narrow) %v907_v32, 16 }
 0x19e   : > { %v820_v36 = vpop.permute.xlu0 %819  ;;  %v823_v37 = vpop.permute.xlu1 %822 }
 0x19f   : > { %v825_v38 = vcombine.low %v810_v20, %v820_v36  ;;  %v826_v39 = vcombine.high %v810_v20, %v820_v36  ;;  %v841_v40 = vcombine.low %v817_v33, %v823_v37  ;;  %v842_v41 = vcombine.high %v817_v33, %v823_v37  ;;  %1030 = vxpose.xlu0.c.b16.start.end [1/1] (short) (narrow) %v910_v26, 16 }
 0x1a0   : > { %v742_v26 = vpack.c.bf16 %v734_v24, %v734_v24 }
 0x1a1   : > { %v833_v43 = vrot.slane %v825_v38, %v2813_v35  ;;  %v840_v44 = vrot.slane %v826_v39, %v2813_v35  ;;  %v849_v45 = vrot.slane %v841_v40, %v2813_v35  ;;  %v856_v46 = vrot.slane %v842_v41, %v2813_v35 }
 0x1a2   : > { %743 = vst.msk [vmem:[#allocation3] sm:$0xf] %vm740_vm2, %v742_v26 }
 0x1a3   : > { %v857_v47 = vcombine.low %v833_v43, %v849_v45  ;;  %v858_v48 = vcombine.high %v833_v43, %v849_v45  ;;  %v873_v49 = vcombine.low %v840_v44, %v856_v46  ;;  %v874_v50 = vcombine.high %v840_v44, %v856_v46 }
 0x1a5   : > { %v865_v51 = vrot.slane %v857_v47, %v2815_v42  ;;  %v872_v52 = vrot.slane %v858_v48, %v2815_v42  ;;  %v881_v53 = vrot.slane %v873_v49, %v2815_v42  ;;  %v888_v54 = vrot.slane %v874_v50, %v2815_v42 }
 0x1a7   : > { %v889_v55 = vcombine.high %v865_v51, %v2549_v0  ;;  %v890_v56 = vcombine.high %v872_v52, %v2549_v0  ;;  %v891_v57 = vcombine.high %v881_v53, %v2549_v0  ;;  %v892_v58 = vcombine.high %v888_v54, %v2549_v0 }
 0x1a8   : > { %v2067_v59 = vpack.c.bf16 %v881_v53, %v865_v51  ;;  %v2068_v60 = vpack.c.bf16 %v888_v54, %v872_v52 }
 0x1a9   : > { %v2069_v61 = vpack.c.bf16 %v891_v57, %v889_v55  ;;  %v2070_v62 = vpack.c.bf16 %v892_v58, %v890_v56  ;;  %v912_v36 = vld [vmem:[#allocation3] sm:$0xf] }
 0x1aa   : > { %v927_v63 = vrot.slane %v2067_v59, %v2813_v35  ;;  %v935_v1 = vrot.slane %v2068_v60, %v2813_v35  ;;  %v1300_v37 = vsel %vm1050_vm3, %v912_v36, 0 }
 0x1ab   : > { %v952_v2 = vrot.slane %v2069_v61, %v2813_v35  ;;  %v960_v4 = vrot.slane %v2070_v62, %v2813_v35 }
 0x1ac   : > { %v936_v5 = vcombine.low %v927_v63, %v935_v1  ;;  %v990_v6 = vpop.trf.xlu0 }
 0x1ad   : > { %v961_v7 = vcombine.low %v952_v2, %v960_v4  ;;  %v1052_v8 = vsel %vm1050_vm3, %v990_v6, 0 }
 0x1ae   : > { %v943_v9 = vrot.slane %v936_v5, %v2815_v42  ;;  %2164 = vmatpush3.bf16.msra.mxu1 %v1052_v8 }
 0x1af   : > { %v968_v10 = vrot.slane %v961_v7, %v2815_v42  ;;  %2175 = vmatprep.subr.bf16.mxu1 %v2549_v0 }
 0x1b0   : > { %v944_v12 = vcombine.high %v943_v9, %v2556_v11  ;;  %v973_v14 = vshrl.u32 %v943_v9, 16 }
 0x1b1   : > { %v972_v13 = vpack.i.b16 %v968_v10, %v943_v9  ;;  %v974_v15 = vshrl.u32 %v968_v10, 16  ;;  %v969_v16 = vcombine.high %v968_v10, %v2556_v11 }
 0x1b2   : > { %v979_v19 = vshrl.u32 %v944_v12, 16 }
 0x1b3   : > { %2166 = vmatmul.mubr.msk.bf16.vlgmr.msra.gmra.mxu1 %vm1046_vm4, %v972_v13  ;;  %v975_v17 = vpack.i.b16 %v974_v15, %v973_v14  ;;  %v978_v18 = vpack.i.b16 %v969_v16, %v944_v12  ;;  %v980_v20 = vshrl.u32 %v969_v16, 16 }
 0x1b4   : > { %2177 = vmatprep.mubr.msk.bf16.mxu1 %vm2550_vm0, %v2549_v0 }
 0x1b5   : > { %v981_v21 = vpack.i.b16 %v980_v20, %v979_v19 }
 0x1f9   : > { %v1006_v29 = vpop.trf.xlu1 }
 0x1fa   : > { %v1098_v30 = vsel %vm1050_vm3, %v1006_v29, 0 }
 0x1fb   : > { %2170 = vmatpush3.bf16.msra.mxu0 %v1098_v30 }
 0x1fc   : > { %2181 = vmatprep.subr.bf16.mxu0 %v2549_v0 }
 0x1fd   : > { %v1022_v31 = vpop.trf.xlu0 }
 0x1fe   : > { %v1144_v32 = vsel %vm1050_vm3, %v1022_v31, 0  ;;  %2172 = vmatmul.mubr.msk.bf16.vlgmr.msra.gmra.mxu0 %vm1046_vm4, %v975_v17 }
 0x1ff   : > { %2176 = vmatpush3.bf16.msra.mxu1 %v1144_v32  ;;  %2183 = vmatprep.mubr.msk.bf16.mxu0 %vm2550_vm0, %v2549_v0 }
 0x200   : > { %2187 = vmatprep.subr.bf16.mxu1 %v2549_v0 }
 0x201   : > { %v1038_v33 = vpop.trf.xlu0 }
 0x202   : > { %v1190_v34 = vsel %vm1050_vm3, %v1038_v33, 0  ;;  %2178 = vmatmul.mubr.msk.bf16.vlgmr.msra.gmra.mxu1 %vm1046_vm4, %v978_v18 }
 0x203   : > { %2182 = vmatpush3.bf16.msra.mxu0 %v1190_v34  ;;  %2189 = vmatprep.mubr.msk.bf16.mxu1 %vm2550_vm0, %v2549_v0 }
 0x204   : > { %2193 = vmatprep.subr.bf16.mxu0 %v2549_v0  ;;  %2188 = vmatpush3.bf16.msra.mxu1 %v1300_v37 }
 0x205   : > { %2199 = vmatprep.subr.bf16.mxu1 %v2549_v0 }
 0x206   : > { %2184 = vmatmul.mubr.msk.bf16.vlgmr.msra.gmra.mxu0 %vm1046_vm4, %v981_v21 }
 0x207   : > { %2195 = vmatprep.mubr.msk.bf16.mxu0 %vm2550_vm0, %v2549_v0 }
 0x273   : > { %v1088_v38 = vpop.f32.mrf.mxu1 }
 0x274   : > { %v1232_v39 = vsel %vm1046_vm4, %v1088_v38, -inf }
 0x275   : > { %1233 = vmax.xlane.f32.xlu1 %v1232_v39  ;;  %v2167_v40 = vpop.f32.mrf.mxu1 }
 0x277   : > { %v1091_v41 = vpop.f32.mrf.mxu1 }
 0x279   : > { %v2168_v43 = vpop.f32.mrf.mxu1 }
 0x286   : > { %914 = vrot.lane.b32.xlu1 %v912_v36, %s2552_s20  ;;  %s1939_s20 = scalar_lea.hbm %s3012_s17, %s2100_s24 }
 0x2be   : > { %v1134_v44 = vpop.f32.mrf.mxu0 }
 0x2bf   : > { %v1235_v45 = vsel %vm1046_vm4, %v1134_v44, -inf }
 0x2c0   : > { %1236 = vmax.xlane.f32.xlu0 %v1235_v45  ;;  %v2173_v46 = vpop.f32.mrf.mxu0 }
 0x2c2   : > { %v1137_v47 = vpop.f32.mrf.mxu0  ;;  %v1180_v48 = vpop.f32.mrf.mxu1 }
 0x2c3   : > { %v1238_v49 = vsel %vm1046_vm4, %v1180_v48, -inf }
 0x2c4   : > { %1239 = vmax.xlane.f32.xlu1 %v1238_v49  ;;  %v2174_v50 = vpop.f32.mrf.mxu0  ;;  %v2179_v51 = vpop.f32.mrf.mxu1 }
 0x2c6   : > { %v1183_v52 = vpop.f32.mrf.mxu1  ;;  %v1226_v53 = vpop.f32.mrf.mxu0 }
 0x2c7   : > { %v1241_v54 = vsel %vm1046_vm4, %v1226_v53, -inf }
 0x2c8   : > { %v2180_v55 = vpop.f32.mrf.mxu1  ;;  %1242 = vmax.xlane.f32.xlu0 %v1241_v54  ;;  %v2185_v56 = vpop.f32.mrf.mxu0 }
 0x2ca   : > { %v1229_v57 = vpop.f32.mrf.mxu0 }
 0x2cc   : > { %v2186_v58 = vpop.f32.mrf.mxu0 }
 0x2d5   : > { %918 = vrot.lane.b32.xlu1 %v912_v36, %s2551_s26 }
 0x2de   : > { %916 = vrot.lane.b32.xlu0 %v912_v36, %s2553_s19  ;;  %s595_s19 = sand.u32 1, %s2526_s25  }
 0x2df   : > { %s2053_s21 = sshll.u32 %s595_s19, 3  ;;  %s1927_s2 = scalar_lea.sflag [#allocation6], %s595_s19 }
 0x2e0   : > { %s597_s23 = scalar_lea.vmem [#allocation10], %s2053_s21 }
 0x2e1   : > { %s1941_s30 = sshll.u32 %s597_s23, 4  ;;  %s1942_s30 = int_to_ptr.vmem [resolvable:$true] %s1941_s30 }
 0x2e2   : > { %s2458_s29 = scalar_lea.vmem %s1942_s30, 128 }
 0x2e3   : > { %p2459_p10 = scmp.ne.s32.totalorder %s1942_s30, %s2458_s29 }
 0x2e5   : > { %p2460_p11 = pnand %p2459_p10, %p2691_p4 }
 0x2e7   : > { %p2461_p13 = pneg %p2460_p11 }
 0x2fe   : > { %v1234_v59 = vpop.xlane.xlu1 %1233 }
 0x2ff   : > { %v1244_v60 = vmax.f32 %v1234_v59, -1e+30 }
 0x301   : > { %v1260_v61 = vsub.f32 %v1088_v38, %v1244_v60  ;;  %v1248_v31 = vsub.f32 -1e+30, %v1244_v60 }
 0x302   : > { %v915_v62 = vpop.permute.xlu1 %914 }
 0x303   : > { %v1264_v63 = vmul.f32 1.442695, %v1260_v61  ;;  %v1346_v1 = vsel %vm1050_vm3, %v915_v62, 0  ;;  %v1252_v32 = vmul.f32 1.442695, %v1248_v31  ;;  %v2344_v31 = vld [vmem:[#allocation7 + $0x8] sm:$0xff]  }
 0x304   : > { %2194 = vmatpush3.bf16.msra.mxu0 %v1346_v1 }
 0x305   : > { %2205 = vmatprep.subr.bf16.mxu0 %v2549_v0  ;;  %2352 = vpow2.f32 %v1264_v63 }
 0x312   : > { %v2353_v2 = vpop.eup %2352 }
 0x313   : > { %v1276_v4 = vsel %vm1046_vm4, %v2353_v2, 0.0  ;;  %v1292_v5 = vpack.c.bf16 %v2353_v2, %v2353_v2 }
 0x314   : > { %1277 = vadd.xlane.f32.xlu1 %v1276_v4 }
 0x315   : > { %2190 = vmatmul.mubr.msk.bf16.vlgmr.msra.gmra.mxu1 %vm1046_vm4, %v1292_v5 }
 0x316   : > { %2201 = vmatprep.mubr.msk.bf16.mxu1 %vm2550_vm0, %v2549_v0 }
 0x349   : > { %v1237_v6 = vpop.xlane.xlu0 %1236 }
 0x34a   : > { %v1245_v7 = vmax.f32 %v1237_v6, -1e+30 }
 0x34c   : > { %v1261_v8 = vsub.f32 %v1134_v44, %v1245_v7  ;;  %v1249_v47 = vsub.f32 -1e+30, %v1245_v7 }
 0x34d   : > { %v1240_v9 = vpop.xlane.xlu1 %1239 }
 0x34e   : > { %v1266_v10 = vmul.f32 1.442695, %v1261_v8  ;;  %v1246_v11 = vmax.f32 %v1240_v9, -1e+30  ;;  %v1254_v50 = vmul.f32 1.442695, %v1249_v47 }
 0x350   : > { %v1262_v12 = vsub.f32 %v1180_v48, %v1246_v11  ;;  %2354 = vpow2.f32 %v1266_v10  ;;  %v1250_v46 = vsub.f32 -1e+30, %v1246_v11 }
 0x351   : > { %v1243_v13 = vpop.xlane.xlu0 %1242  ;;  %v919_v21 = vpop.permute.xlu1 %918 }
 0x352   : > { %v1268_v14 = vmul.f32 1.442695, %v1262_v12  ;;  %v1247_v15 = vmax.f32 %v1243_v13, -1e+30  ;;  %v1438_v24 = vsel %vm1050_vm3, %v919_v21, 0 }
 0x353   : > { %v1256_v48 = vmul.f32 1.442695, %v1250_v46 }
 0x354   : > { %2356 = vpow2.f32 %v1268_v14  ;;  %v1263_v16 = vsub.f32 %v1226_v53, %v1247_v15  ;;  %v1251_v49 = vsub.f32 -1e+30, %v1247_v15 }
 0x355   : > { %v917_v17 = vpop.permute.xlu0 %916 }
 0x356   : > { %v1392_v18 = vsel %vm1050_vm3, %v917_v17, 0  ;;  %v1270_v19 = vmul.f32 1.442695, %v1263_v16  ;;  %v1258_v51 = vmul.f32 1.442695, %v1251_v49 }
 0x357   : > { %2200 = vmatpush3.bf16.msra.mxu1 %v1392_v18 }
 0x358   : > { %2211 = vmatprep.subr.bf16.mxu1 %v2549_v0  ;;  %2358 = vpow2.f32 %v1270_v19 }
 0x359   : > { %2360 = vpow2.f32 %v1252_v32 }
 0x35d   : > { %v2355_v20 = vpop.eup %2354 }
 0x35e   : > { %v1279_v22 = vsel %vm1046_vm4, %v2355_v20, 0.0  ;;  %v1293_v23 = vpack.c.bf16 %v2355_v20, %v2355_v20 }
 0x35f   : > { %1280 = vadd.xlane.f32.xlu0 %v1279_v22 }
 0x360   : > { %2196 = vmatmul.mubr.msk.bf16.vlgmr.msra.gmra.mxu0 %vm1046_vm4, %v1293_v23 }
 0x361   : > { %v2357_v25 = vpop.eup %2356  ;;  %2206 = vmatpush3.bf16.msra.mxu0 %v1438_v24  ;;  %2207 = vmatprep.mubr.msk.bf16.mxu0 %vm2550_vm0, %v2549_v0 }
 0x362   : > { %v1282_v26 = vsel %vm1046_vm4, %v2357_v25, 0.0  ;;  %v1294_v27 = vpack.c.bf16 %v2357_v25, %v2357_v25  ;;  %2219 = vmatprep.subr.bf16.mxu0 %v2549_v0 }
 0x363   : > { %1283 = vadd.xlane.f32.xlu0 %v1282_v26 }
 0x364   : > { %2202 = vmatmul.mubr.msk.bf16.vlgmr.msra.gmra.mxu1 %vm1046_vm4, %v1294_v27 }
 0x365   : > { %2215 = vmatprep.mubr.msk.bf16.mxu1 %vm2550_vm0, %v2549_v0  ;;  %v2359_v28 = vpop.eup %2358  ;;  %2212 = vmatpush3.bf16.msra.mxu1 %v2344_v31 }
 0x366   : > { %v1285_v29 = vsel %vm1046_vm4, %v2359_v28, 0.0  ;;  %v1295_v30 = vpack.c.bf16 %v2359_v28, %v2359_v28  ;;  %v2361_v33 = vpop.eup %2360  ;;  %2213 = vmatprep.subr.bf16.mxu1 %v2549_v0 }
 0x367   : > { %1286 = vadd.xlane.f32.xlu1 %v1285_v29  ;;  %v1272_v36 = vmul.f32 0.0, %v2361_v33 }
 0x368   : > { %2208 = vmatmul.mubr.msk.bf16.vlgmr.msra.gmra.mxu0 %vm1046_vm4, %v1295_v30 }
 0x369   : > { %2223 = vmatprep.mubr.msk.bf16.mxu0 %vm2550_vm0, %v2549_v0 }
 0x39d   : > { %v1278_v34 = vpop.xlane.xlu1 %1277 }
 0x39e   : > { %v1288_v37 = vadd.f32 %v1278_v34, %v1272_v36 }
 0x3a0   : > { %2362 = vrcp.f32 %v1288_v37 }
 0x3a1   : > { %2364 = vpow2.f32 %v1256_v48 }
 0x3a2   : > { %2366 = vpow2.f32 %v1254_v50 }
 0x3a3   : > { %2368 = vpow2.f32 %v1258_v51 }
 0x3ad   : > { %v2363_v40 = vpop.eup %2362 }
 0x3ae   : > { %v2365_v53 = vpop.eup %2364 }
 0x3af   : > { %v1274_v55 = vmul.f32 0.0, %v2365_v53  ;;  %v2367_v56 = vpop.eup %2366 }
 0x3b0   : > { %v2369_v57 = vpop.eup %2368  ;;  %v1273_v59 = vmul.f32 0.0, %v2367_v56 }
 0x3b1   : > { %v1275_v61 = vmul.f32 0.0, %v2369_v57 }
 0x3d5   : > { %v1336_v38 = vpop.f32.mrf.mxu1 }
 0x3d6   : > { %v1480_v39 = vadd.f32 %v1336_v38, %v1272_v36 }
 0x3d7   : > { %v2191_v41 = vpop.f32.mrf.mxu1 }
 0x3d8   : > { %v1488_v43 = vmul.f32 %v2363_v40, %v1480_v39  ;;  %v2345_v41 = vld [vmem:[#allocation7] sm:$0xff]  }
 0x3d9   : > { %v1339_v44 = vpop.f32.mrf.mxu1  ;;  %2214 = vmatpush3.bf16.msra.mxu1 %v2345_v41 }
 0x3da   : > { %2227 = vmatprep.subr.bf16.mxu1 %v2549_v0 }
 0x3db   : > { %v2192_v45 = vpop.f32.mrf.mxu1 }
 0x3e8   : > { %v1281_v52 = vpop.xlane.xlu0 %1280 }
 0x3e9   : > { %v1289_v62 = vadd.f32 %v1281_v52, %v1273_v59 }
 0x3ec   : > { %v1284_v54 = vpop.xlane.xlu0 %1283 }
 0x3ed   : > { %v1290_v58 = vadd.f32 %v1284_v54, %v1274_v55 }
 0x3ef   : > { %2370 = vrcp.f32 %v1290_v58 }
 0x3f0   : > { %v1287_v60 = vpop.xlane.xlu1 %1286  ;;  %2372 = vrcp.f32 %v1289_v62 }
 0x3f1   : > { %v1291_v63 = vadd.f32 %v1287_v60, %v1275_v61 }
 0x3f3   : > { %2374 = vrcp.f32 %v1291_v63 }
 0x3fc   : > { %v2371_v7 = vpop.eup %2370 }
 0x3fd   : > { %v2373_v16 = vpop.eup %2372 }
 0x400   : > { %v2375_v19 = vpop.eup %2374 }
 0x420   : > { %v1382_v1 = vpop.f32.mrf.mxu0 }
 0x421   : > { %v1481_v11 = vadd.f32 %v1382_v1, %v1273_v59 }
 0x422   : > { %v2197_v2 = vpop.f32.mrf.mxu0 }
 0x423   : > { %v1489_v21 = vmul.f32 %v2373_v16, %v1481_v11 }
 0x424   : > { %v1385_v4 = vpop.f32.mrf.mxu0  ;;  %v1428_v5 = vpop.f32.mrf.mxu1 }
 0x425   : > { %v1482_v6 = vadd.f32 %v1428_v5, %v1274_v55 }
 0x426   : > { %v2198_v8 = vpop.f32.mrf.mxu0  ;;  %v2203_v9 = vpop.f32.mrf.mxu1 }
 0x427   : > { %v1490_v10 = vmul.f32 %v2371_v7, %v1482_v6  ;;  %v2081_v6 = vld [vmem:[%s3003_s8] ss:$0 sm:$0xff] }
 0x428   : > { %v1431_v12 = vpop.f32.mrf.mxu1  ;;  %v1474_v15 = vpop.f32.mrf.mxu0 }
 0x429   : > { %v1492_v13 = vcombine.low %v1488_v43, %v1490_v10  ;;  %v1493_v14 = vcombine.high %v1488_v43, %v1490_v10  ;;  %v1483_v17 = vadd.f32 %v1474_v15, %v1275_v61 }
 0x42a   : > { %v2204_v18 = vpop.f32.mrf.mxu1  ;;  %v2209_v20 = vpop.f32.mrf.mxu0 }
 0x42b   : > { %v1491_v22 = vmul.f32 %v2375_v19, %v1483_v17  ;;  %v1500_v27 = vrot.slane %v1492_v13, %v2813_v35  ;;  %v1507_v28 = vrot.slane %v1493_v14, %v2813_v35  ;;  %v2346_v19 = vld [vmem:[#allocation9 + $0x8] sm:$0xff]   ;;  %v2347_v20 = vld [vmem:[#allocation9] sm:$0xff]  }
 0x42c   : > { %v1477_v23 = vpop.f32.mrf.mxu0  ;;  %2220 = vmatpush3.bf16.msra.mxu0 %v2346_v19 }
 0x42d   : > { %v1508_v24 = vcombine.low %v1489_v21, %v1491_v22  ;;  %v1509_v25 = vcombine.high %v1489_v21, %v1491_v22  ;;  %2221 = vmatprep.subr.bf16.mxu0 %v2549_v0  ;;  %v2349_v21 = vld [vmem:[%s3008_s13 + $0x10] sm:$0xff]  }
 0x42e   : > { %v2210_v26 = vpop.f32.mrf.mxu0 }
 0x42f   : > { %v1516_v29 = vrot.slane %v1508_v24, %v2813_v35  ;;  %v1523_v30 = vrot.slane %v1509_v25, %v2813_v35  ;;  %v2085_v26 = vld [vmem:[%s3004_s9] ss:$0 sm:$0xff] }
 0x430   : > { %2222 = vmatpush3.bf16.msra.mxu0 %v2347_v20 }
 0x431   : > { %v1524_v32 = vcombine.low %v1500_v27, %v1516_v29  ;;  %v1525_v33 = vcombine.high %v1500_v27, %v1516_v29  ;;  %v1540_v34 = vcombine.low %v1507_v28, %v1523_v30  ;;  %v1541_v36 = vcombine.high %v1507_v28, %v1523_v30  ;;  %v2086_v28 = vld [vmem:[%s3005_s10] ss:$0 sm:$0xff] }
 0x433   : > { %v1532_v37 = vrot.slane %v1524_v32, %v2815_v42  ;;  %v1539_v38 = vrot.slane %v1525_v33, %v2815_v42  ;;  %v1548_v39 = vrot.slane %v1540_v34, %v2815_v42  ;;  %v1555_v40 = vrot.slane %v1541_v36, %v2815_v42  ;;  %v2350_v32 = vld [vmem:[%s3008_s13 + $0x8] sm:$0xff]   ;;  %v2351_v33 = vld [vmem:[%s3008_s13] sm:$0xff]  }
 0x434   : > { %v2087_v34 = vld [vmem:[%s3007_s12] ss:$0 sm:$0xff] }
 0x435   : > { %v1560_v43 = vcombine.low %v1532_v37, %v1539_v38  ;;  %v2079_v44 = vcombine.high %v1532_v37, %v1539_v38  ;;  %v1576_v45 = vcombine.low %v1548_v39, %v1555_v40  ;;  %v2080_v46 = vcombine.high %v1548_v39, %v1555_v40 }
 0x437   : > { %v1567_v47 = vrot.slane %v1560_v43, %v2813_v35  ;;  %v1575_v48 = vrot.slane %v2079_v44, %v2813_v35  ;;  %v1583_v49 = vrot.slane %v1576_v45, %v2813_v35  ;;  %v1591_v50 = vrot.slane %v2080_v46, %v2813_v35 }
 0x439   : > { %v1593_v51 = vcombine.high %v1567_v47, %v1575_v48  ;;  %v1609_v52 = vcombine.high %v1583_v49, %v1591_v50  ;;  %v1592_v53 = vcombine.low %v1567_v47, %v1575_v48  ;;  %v1608_v54 = vcombine.low %v1583_v49, %v1591_v50 }
 0x43b   : > { %v1607_v55 = vrot.slane %v1593_v51, %v2815_v42  ;;  %v1623_v56 = vrot.slane %v1609_v52, %v2815_v42  ;;  %v1600_v57 = vrot.slane %v1592_v53, %v2815_v42  ;;  %v1616_v58 = vrot.slane %v1608_v54, %v2815_v42 }
 0x43d   : > { %v1626_v59 = vcombine.low %v1607_v55, %v1623_v56  ;;  %v1625_v60 = vcombine.high %v1600_v57, %v1616_v58  ;;  %v1627_v61 = vcombine.high %v1607_v55, %v1623_v56  ;;  %v1624_v62 = vcombine.low %v1600_v57, %v1616_v58 }
 0x43f   : > { %1633 = vrot.lane.b32.xlu1 %v1626_v59, %s2557_s28  ;;  %1629 = vrot.lane.b32.xlu0 %v1625_v60, %s2558_s18  ;;  %v2097_v60 = vld [vmem:[%s3010_s15] ss:$0 sm:$0xff]  ;;  %s2560_s28 = smov [#allocation10]  }
 0x440   : > { %s2462_s18 = sshll.u32 %s2560_s28, 4  ;;  %s2463_s18 = int_to_ptr.vmem [resolvable:$false] %s2462_s18 }
 0x441   : > { %s2464_s27 = scalar_lea.vmem %s2463_s18, 256  ;;  %p2465_p3 = scmp.lt.s32.totalorder %s1942_s30, %s2463_s18 }
 0x442   : > { %p2466_p6 = scmp.lt.s32.totalorder %s2464_s27, %s2458_s29 }
 0x443   : > { %1637 = vrot.lane.b32.xlu1 %v1627_v61, %s2559_s22 }
 0x444   : > { %p2467_p7 = por %p2466_p6, %p2465_p3 }
 0x446   : > { %p2468_p9 = pnand %p2467_p7, %p2461_p13 }
 0x4b1   : > { %v1634_v35 = vpop.permute.xlu1 %1633  ;;  %v1630_v63 = vpop.permute.xlu0 %1629 }
 0x4b2   : > { %v1640_v1 = vsel %vm1046_vm4, %v1624_v62, %v1630_v63  ;;  %v2098_v62 = vld [vmem:[%s3011_s16] ss:$0 sm:$0xff] }
 0x4b3   : > { %v1642_v4 = vsel %vm1641_vm5, %v1640_v1, %v1634_v35 }
 0x4b5   : > { %v1638_v2 = vpop.permute.xlu1 %1637 }
 0x4b6   : > { %v1644_v5 = vsel %vm1643_vm6, %v1642_v4, %v1638_v2 }
 0x4b7   : > { %v1645_v42 = vpack.c.bf16 %v1644_v5, %v1644_v5 }
 0x4b9   : > { %2216 = vmatmul.mubr.msk.bf16.vlgmr.msra.gmra.mxu1 %vm632_vm1, %v1645_v42 }
 0x4ba   : > { %2235 = vmatprep.mubr.msk.bf16.mxu1 %vm2550_vm0, %v2549_v0 }
 0x579   : > { %v1706_v7 = vpop.f32.mrf.mxu1 }
 0x57a   : > { %v1707_v8 = vadd.f32 %v2081_v6, %v1706_v7 }
 0x57b   : > { %v2217_v9 = vpop.f32.mrf.mxu1 }
 0x57c   : > { %v1712_v10 = vadd.f32 %v1707_v8, %v2775_v3  ;;  %v2348_v3 = vld [vmem:[%s3008_s13 + $0x18] sm:$0xff]  }
 0x57d   : > { %v1709_v11 = vpop.f32.mrf.mxu1  ;;  %2228 = vmatpush3.bf16.msra.mxu1 %v2348_v3 }
 0x57e   : > { %v1715_v12 = vsel %vm632_vm1, %v1712_v10, 0.0  ;;  %2229 = vmatprep.subr.bf16.mxu1 %v2549_v0 }
 0x57f   : > { %1716 = vadd.xlane.f32.xlu0 %v1715_v12  ;;  %v2218_v13 = vpop.f32.mrf.mxu1 }
 0x581   : > { %2230 = vmatpush3.bf16.msra.mxu1 %v2349_v21 }
 0x582   : > { %2231 = vmatprep.subr.bf16.mxu1 %v2549_v0 }
 0x585   : > { %2232 = vmatpush3.bf16.msra.mxu1 %v2350_v32 }
 0x586   : > { %2233 = vmatprep.subr.bf16.mxu1 %v2549_v0  ;;  %v2091_v0 = vld [vmem:[%s3009_s14] ss:$0 sm:$0xff] }
 0x589   : > { %2234 = vmatpush3.bf16.msra.mxu1 %v2351_v33 }
 0x608   : > { %v1717_v14 = vpop.xlane.xlu0 %1716 }
 0x609   : > { %v1719_v15 = vmul.f32 0.03125, %v1717_v14 }
 0x60b   : > { %v1720_v16 = vsub.f32 %v1712_v10, %v1719_v15 }
 0x60d   : > { %v1721_v17 = vmul.f32 %v1720_v16, %v1720_v16 }
 0x60f   : > { %v1722_v18 = vsel %vm632_vm1, %v1721_v17, 0.0 }
 0x610   : > { %1723 = vadd.xlane.f32.xlu1 %v1722_v18 }
 0x699   : > { %v1724_v22 = vpop.xlane.xlu1 %1723 }
 0x69a   : > { %v1725_v23 = vmul.f32 0.03125, %v1724_v22 }
 0x69c   : > { %v1726_v24 = vadd.f32 1e-05, %v1725_v23 }
 0x69e   : > { %2376 = vrsqrt.f32 %v1726_v24 }
 0x6ab   : > { %v2377_v25 = vpop.eup %2376 }
 0x6ac   : > { %v1728_v27 = vmul.f32 %v2377_v25, %v1720_v16 }
 0x6ae   : > { %v1735_v29 = vmul.f32 %v2085_v26, %v1728_v27 }
 0x6b0   : > { %v1742_v30 = vadd.f32 %v2086_v28, %v1735_v29 }
 0x6b2   : > { %v1743_v31 = vpack.c.bf16 %v1742_v30, %v1742_v30 }
 0x6b4   : > { %2224 = vmatmul.mubr.msk.bf16.vlgmr.msra.gmra.mxu0 %vm632_vm1, %v1743_v31 }
 0x774   : > { %v1804_v36 = vpop.f32.mrf.mxu0 }
 0x775   : > { %v1805_v37 = vadd.f32 %v2087_v34, %v1804_v36 }
 0x776   : > { %v2225_v38 = vpop.f32.mrf.mxu0 }
 0x777   : > { %v1810_v39 = vmax.f32 %v1805_v37, 0.0 }
 0x778   : > { %v1807_v40 = vpop.f32.mrf.mxu0 }
 0x779   : > { %v1811_v41 = vpack.c.bf16 %v1810_v39, %v1810_v39 }
 0x77a   : > { %v2226_v43 = vpop.f32.mrf.mxu0 }
 0x77b   : > { %2236 = vmatmul.mubr.msk.bf16.vlgmr.msra.gmra.mxu1 %vm1851_vm7, %v1811_v41 }
 0x83b   : > { %v1889_v44 = vpop.f32.mrf.mxu1 }
 0x83c   : > { %v1890_v45 = vadd.f32 %v2091_v0, %v1889_v44 }
 0x83d   : > { %v2237_v46 = vpop.f32.mrf.mxu1 }
 0x83e   : > { %v1895_v47 = vadd.f32 %v1890_v45, %v1742_v30 }
 0x83f   : > { %v1892_v48 = vpop.f32.mrf.mxu1 }
 0x840   : > { %v1898_v49 = vsel %vm632_vm1, %v1895_v47, 0.0 }
 0x841   : > { %1899 = vadd.xlane.f32.xlu0 %v1898_v49  ;;  %v2238_v50 = vpop.f32.mrf.mxu1 }
 0x8ca   : > { %v1900_v51 = vpop.xlane.xlu0 %1899 }
 0x8cb   : > { %v1901_v52 = vmul.f32 0.03125, %v1900_v51 }
 0x8cd   : > { %v1902_v53 = vsub.f32 %v1895_v47, %v1901_v52 }
 0x8cf   : > { %v1903_v54 = vmul.f32 %v1902_v53, %v1902_v53 }
 0x8d1   : > { %v1904_v55 = vsel %vm632_vm1, %v1903_v54, 0.0 }
 0x8d2   : > { %1905 = vadd.xlane.f32.xlu0 %v1904_v55 }
 0x95b   : > { %v1906_v56 = vpop.xlane.xlu0 %1905 }
 0x95c   : > { %v1907_v57 = vmul.f32 0.03125, %v1906_v56 }
 0x95e   : > { %v1908_v58 = vadd.f32 1e-05, %v1907_v57 }
 0x960   : > { %2378 = vrsqrt.f32 %v1908_v58 }
 0x96d   : > { %v2379_v59 = vpop.eup %2378 }
 0x96e   : > { %v1910_v61 = vmul.f32 %v2379_v59, %v1902_v53 }
 0x970   : > { %v1917_v35 = vmul.f32 %v2097_v60, %v1910_v61 }
 0x972   : > { %v1924_v63 = vadd.f32 %v2098_v62, %v1917_v35 }
 0x974   : > { %1925 = vst.msk [vmem:[%s597_s23] sm:$0xff] %vm632_vm1, %v1924_v63 }
 0x975   : > { %2471 = shalt.err (!%p2468_p9)
}
 0x976   : > { %s2472_s21 = scalar_lea.hbm %s1939_s20, 128  ;;  %s2476_s24 = scalar_lea.hbm %s3012_s17, 256 }
 0x977   : > { %p2473_p12 = scmp.ne.s32.totalorder %s1939_s20, %s2472_s21  ;;  %p2477_p2 = scmp.lt.s32.totalorder %s1939_s20, %s3012_s17 }
 0x978   : > { %p2478_p5 = scmp.lt.s32.totalorder %s2476_s24, %s2472_s21 }
 0x979   : > { %p2474_p1 = pnand %p2473_p12, %p2691_p4 }
 0x97a   : > { %p2479_p0 = por %p2478_p5, %p2477_p2 }
 0x97b   : > { %p2475_p8 = pneg %p2474_p1 }
 0x97d   : > { %p2480_p10 = pnand %p2479_p0, %p2475_p8 }
 0x97f   : > { %2483 = shalt.err (!%p2480_p10)
}
 0x980   : > { %2251 = dma.vmem_to_hbm [thread:$0]  (%p2691_p4), %s1942_s30, 128, %s1939_s20, %s1927_s2  }
 0x981 PF: > { %s3042_s26 = sld [smem:[#allocation17_spill]] }
 0x982   : > { %s3043_s29 = sld [smem:[#allocation14_spill]] }
 0x983   : > { %s3044_s28 = sld [smem:[#allocation19_spill]] }
 0x987   : > { %p2273_p11 = scmp.ge.s32.totalorder %s3042_s26, 2 }
 0x988   : > { %s1953_s18 = sand.u32 1, %s3043_s29  }
 0x989   : > { %p3045_p13 = scmp.ne.s32.totalorder %s3044_s28, 0  ;;  %s1954_s27 = scalar_lea.sflag [#allocation6], %s1953_s18 }
 0x98b   : > { %p2264_p3 = pnand %p2273_p11, %p3045_p13 }
 0x98d   : > { %p2265_p6 = pneg %p2264_p3 }
 0x98f   : > { %2517 = dma.done.wait (%p2265_p6), %s1954_s27, 128  }
 0x990   : > { %2519 = vsyncadd (%p2265_p6), %s1954_s27, 4294967168  ;;  %s32_s29 = sadd.s32 1, %s3042_s26   ;;  %s3046_s21 = sld [smem:[#allocation15_spill]] }
 0x991   : > { %p29_p7 = scmp.ge.s32.totalorder %s32_s29, 4   ;;  %s3047_s26 = sld [smem:[#allocation20_spill]] }
 0x992   : > { %s3048_s27 = sld [smem:[#allocation16_spill]]  ;;  %s3050_s24 = smov %s2526_s25 }
 0x993   : > { %s3049_s28 = sld [smem:[#allocation18_spill]]  ;;  %31 = sbr.rel (!%p29_p7) target bundleno = 11 (0xb), region = 141 }
 0x996   : > { %s3051_s25 = smov %s3046_s21 }
 0x998   :  { %1959 = vsyncpa [#allocation5], 1 }
 0x999   :  { %1961 = vsyncpa [#allocation5 + $0x1], 1 }
 0x99a   :  { %1962 = vsyncpa [#allocation8], 1 }
 0x99b   :  { %1963 = vsyncpa [#allocation6], 1 }
 0x99c   :  { %1965 = vsyncpa [#allocation6 + $0x1], 1 }

// kernel: tpu_custom_call.1
= control target key start
LH: loop header
LB: loop body
LE: loop exit
PB: predicated region body
PF: predicated region fallthrough
CT: control target
= control target key end

     0   :  { %s2995_s0 = inlined_call_operand.vmem [shape: f32[2,8,32], index: 0, kind: input, shape index: {}]   ;;  %s2996_s1 = inlined_call_operand.vmem [shape: bf16[32,32], index: 1, kind: input, shape index: {}]   ;;  %s2997_s2 = inlined_call_operand.vmem [shape: bf16[32,32], index: 2, kind: input, shape index: {}]   ;;  %s2998_s3 = inlined_call_operand.hbm [shape: bf16[32,32], index: 3, kind: input, shape index: {}]   ;;  %s2999_s4 = inlined_call_operand.vmem [shape: f32[1,32], index: 4, kind: input, shape index: {}]   ;;  %s3000_s5 = inlined_call_operand.vmem [shape: f32[1,32], index: 5, kind: input, shape index: {}]   ;;  %s3001_s6 = inlined_call_operand.vmem [shape: f32[1,32], index: 6, kind: input, shape index: {}]   ;;  %s3002_s7 = inlined_call_operand.hbm [shape: bf16[32,32], index: 7, kind: input, shape index: {}]   ;;  %s3003_s8 = inlined_call_operand.vmem [shape: f32[1,32], index: 8, kind: input, shape index: {}]   ;;  %s3004_s9 = inlined_call_operand.vmem [shape: f32[1,32], index: 9, kind: input, shape index: {}]   ;;  %s3005_s10 = inlined_call_operand.vmem [shape: f32[1,32], index: 10, kind: input, shape index: {}]   ;;  %s3006_s11 = inlined_call_operand.hbm [shape: bf16[32,64], index: 11, kind: input, shape index: {}]   ;;  %s3007_s12 = inlined_call_operand.vmem [shape: f32[1,64], index: 12, kind: input, shape index: {}]   ;;  %s3008_s13 = inlined_call_operand.vmem [shape: bf16[64,32], index: 13, kind: input, shape index: {}]   ;;  %s3009_s14 = inlined_call_operand.vmem [shape: f32[1,32], index: 14, kind: input, shape index: {}]   ;;  %s3010_s15 = inlined_call_operand.vmem [shape: f32[1,32], index: 15, kind: input, shape index: {}]   ;;  %s3011_s16 = inlined_call_operand.vmem [shape: f32[1,32], index: 16, kind: input, shape index: {}]   ;;  %s3012_s17 = inlined_call_operand.hbm [shape: f32[2,8,32], index: 17, kind: output, shape index: {}]  }
   0x1   :  { %3021 = sst [smem:[#allocation21_spill]] %s2995_s0 }
   0x2   :  { %3022 = sst [smem:[#allocation22_spill]] %s2996_s1 }
   0x3   :  { %3023 = sst [smem:[#allocation23_spill]] %s2997_s2 }
   0x4   :  { %3024 = sst [smem:[#allocation24_spill]] %s2998_s3 }
   0x5   :  { %22 = vsyncpa [#allocation5], 0 }
   0x6   :  { %23 = vsyncpa [#allocation8], 0 }
   0x7   :  { %24 = vsyncpa [#allocation6], 0 }
   0x8   :  { %26 = vsyncpa [#allocation6 + $0x1], 0  ;;  %s2651_s24 = smov 0   ;;  %s2653_s25 = smov 0  }
   0x9   :  { %s2655_s26 = smov 0   ;;  %s2657_s27 = smov 0  }
   0xa   :  { %s2659_s28 = smov 0   ;;  %s2661_s29 = smov 0  }
   0xb LB: > { %3025 = sst [smem:[#allocation14_spill]] %s2522_s24  ;;  %s2042_s0 = sadd.s32 4294967295, %s2542_s29   ;;  %s2542_s29 = sphi %s2661_s29, %s32_s29   ;;  %s2538_s28 = sphi %s2659_s28, %s3049_s28   ;;  %s2534_s27 = sphi %s2657_s27, %s3048_s27   ;;  %s2530_s26 = sphi %s2655_s26, %s3047_s26   ;;  %s2526_s25 = sphi %s2653_s25, %s3051_s25   ;;  %s2522_s24 = sphi %s2651_s24, %s3050_s24  }
   0xc   : > { %3026 = sst [smem:[#allocation15_spill]] %s2530_s26  ;;  %s2043_s30 = sadd.s32 4294967294, %s2542_s29  }
   0xd   : > { %3027 = sst [smem:[#allocation16_spill]] %s2538_s28  ;;  %s44_s18 = sadd.s32 1, %s2538_s28 }
   0xe   : > { %3028 = sst [smem:[#allocation17_spill]] %s2542_s29  ;;  %s415_s19 = sadd.s32 1, %s2530_s26 }
   0xf   : > { %p46_p0 = scmp.ge.s32.totalorder %s44_s18, 2  ;;  %p425_p1 = scmp.ne.s32.totalorder %s2530_s26, %s2526_s25 }
  0x10   : > { %p426_p2 = scmp.eq.s32.totalorder %s2042_s0, 1  ;;  %p431_p3 = scmp.ne.s32.totalorder %s2526_s25, %s2522_s24 }
  0x11   : > { %s3053_s18 = smov (%p46_p0, %s44_s18), 0  ;;  %p432_p5 = scmp.eq.s32.totalorder %s2043_s30, 1 }
  0x12   : > { %3029 = sst [smem:[#allocation18_spill]] %s3053_s18  ;;  %p2691_p4 = por %p426_p2, %p425_p1 }
  0x13   : > { %s410_s20 = ssub.s32 %s2538_s28, %s3053_s18  ;;  %p2044_p6 = scmp.ge.s32.totalorder %s2542_s29, 1 }
  0x14   : > { %p413_p7 = scmp.eq.s32.totalorder %s410_s20, 0  ;;  %p2698_p8 = por %p432_p5, %p431_p3 }
  0x15   : > { %p439_p9 = scmp.lt.s32.totalorder %s2542_s29, 3  ;;  %p2710_p11 = scmp.eq.s32.totalorder %s2042_s0, 0 }
  0x16   : > { %s3031_s21 = scalar_select %p2698_p8, 1, 0 }
  0x17   : > { %s2704_s22 = scalar_select %p413_p7, %s2530_s26, %s415_s19  }
  0x18   : > { %3032 = sst [smem:[#allocation19_spill]] %s3031_s21  ;;  %p2706_p10 = pnand %p2044_p6, %p439_p9 }
  0x19   : > { %3033 = sst [smem:[#allocation20_spill]] %s2704_s22  ;;  %s2544_s30 = smov [#allocation7]  }
  0x1a   : > { %p2253_p12 = pneg %p2706_p10  ;;  %s479_s20 = sshll.u32 %s2544_s30, 4  ;;  %s480_s20 = int_to_ptr.vmem [resolvable:$true] %s479_s20 }
  0x1b   : > { %s2545_s19 = smov [#allocation4]   ;;  %s2391_s0 = scalar_lea.vmem %s480_s20, 256 }
  0x1c   : > { %p2718_p13 = pnand %p2710_p11, %p2253_p12  ;;  %s457_s28 = sshll.u32 %s2545_s19, 4  ;;  %s458_s28 = int_to_ptr.vmem [resolvable:$true] %s457_s28 }
  0x1d   : > { %p2392_p1 = scmp.ne.s32.totalorder %s480_s20, %s2391_s0  ;;  %p2399_p5 = scmp.lt.s32.totalorder %s480_s20, %s480_s20 }
  0x1e   : > { %p2382_p0 = pneg %p2718_p13  ;;  %p2400_p6 = scmp.lt.s32.totalorder %s2391_s0, %s2391_s0 }
  0x20   : > { %p2394_p2 = pnand %p2392_p1, %p2382_p0  ;;  %p2401_p7 = por %p2400_p6, %p2399_p5 }
  0x22   : > { %p2395_p3 = pneg %p2394_p2 }
  0x24   : > { %p2402_p9 = pnand %p2401_p7, %p2395_p3 }
  0x26   : > { %2405 = shalt.err (!%p2402_p9)
}
  0x27   : > { %s2546_s30 = smov 64   ;;  %s2547_s22 = smov 4  }
  0x28   : > { %2259 = dma.hbm_to_vmem [thread:$0]  (!%p2718_p13), %s3002_s7, 256, %s480_s20, [#allocation8], %s2546_s30, %s2546_s30, %s2547_s22  }
  0x29   : > { %s2417_s21 = scalar_lea.vmem %s458_s28, 256  ;;  %p2425_p8 = scmp.lt.s32.totalorder %s458_s28, %s458_s28 }
  0x2a   : > { %p2418_p12 = scmp.ne.s32.totalorder %s458_s28, %s2417_s21  ;;  %p2426_p5 = scmp.lt.s32.totalorder %s2417_s21, %s2417_s21 }
  0x2c   : > { %p2420_p1 = pnand %p2418_p12, %p2382_p0  ;;  %p2427_p3 = por %p2426_p5, %p2425_p8 }
  0x2e   : > { %p2421_p2 = pneg %p2420_p1 }
  0x30   : > { %p2428_p6 = pnand %p2427_p3, %p2421_p2 }
  0x32   : > { %2431 = shalt.err (!%p2428_p6)
}
  0x33   : > { %s3037_s3 = sld [smem:[#allocation24_spill]]  ;;  %s2548_s26 = smov [#allocation9]  }
  0x34   : > { %s501_s20 = sshll.u32 %s2548_s26, 4  ;;  %s502_s20 = int_to_ptr.vmem [resolvable:$true] %s501_s20 }
  0x35   : > { %s2443_s19 = scalar_lea.vmem %s502_s20, 256  ;;  %p2451_p1 = scmp.lt.s32.totalorder %s502_s20, %s502_s20 }
  0x36   : > { %p2444_p7 = scmp.ne.s32.totalorder %s502_s20, %s2443_s19  ;;  %p2452_p8 = scmp.lt.s32.totalorder %s2443_s19, %s2443_s19 }
  0x38   : > { %p2446_p9 = pnand %p2444_p7, %p2382_p0  ;;  %p2453_p2 = por %p2452_p8, %p2451_p1 }
  0x39   : > { %2256 = dma.hbm_to_vmem [thread:$0]  (!%p2718_p13), %s3037_s3, 256, %s458_s28, [#allocation5], %s2546_s30, %s2546_s30, %s2547_s22  }
  0x3a   : > { %p2447_p12 = pneg %p2446_p9 }
  0x3c   : > { %p2454_p5 = pnand %p2453_p2, %p2447_p12 }
  0x3e   : > { %2457 = shalt.err (!%p2454_p5)
}
  0x3f   : > { %2262 = dma.hbm_to_vmem [thread:$0]  (!%p2718_p13), %s3006_s11, 256, %s502_s20, [#allocation8], %s2546_s30, %s2546_s30, %s2547_s22  }
  0x40   : > { %539 = sbr.rel (%p2706_p10) target bundleno = 2433 (0x981), region = 88 }
  0x45   : > { %2509 = dma.done.wait (%p2710_p11), [#allocation5], 256  }
  0x46   : > { %2511 = vsyncadd (%p2710_p11), [#allocation5], 4294967040 }
  0x47   : > { %2513 = dma.done.wait (%p2710_p11), [#allocation8], 512  }
  0x48   : > { %2515 = vsyncadd (%p2710_p11), [#allocation8], 4294966784  ;;  %p598_p0 = scmp.lt.s32.totalorder %s2534_s27, 1  ;;  %v2549_v0 = vmov 0.0   ;;  %vm2550_vm0 = vmmov 0   ;;  %s3038_s23 = sld [smem:[#allocation21_spill]]  ;;  %v830_v25 = vlaneseq }
  0x49   : > { %2139 = vmatprep.subr.bf16.mxu0 %v2549_v0  ;;  %2143 = vmatprep.mubr.msk.bf16.mxu0 %vm2550_vm0, %v2549_v0  ;;  %s3039_s2 = sld [smem:[#allocation23_spill]]  ;;  %vm632_vm1 = vcmask 261120   ;;  %v2055_v7 = vld [vmem:[%s3000_s5] ss:$0 sm:$0xff]  ;;  %vm740_vm2 = vcmask 257024   ;;  %v2342_v19 = vld [vmem:[#allocation4 + $0x8] sm:$0xff]  }
  0x4a   : > { %s599_s28 = scalar_select %p598_p0, %s2534_s27, 1  ;;  %2147 = vmatprep.subr.bf16.mxu1 %v2549_v0  ;;  %2151 = vmatprep.mubr.msk.bf16.mxu1 %vm2550_vm0, %v2549_v0  ;;  %v2063_v15 = vld [vmem:[%s2999_s4] ss:$0 sm:$0xff]  ;;  %v2343_v22 = vld [vmem:[#allocation4] sm:$0xff]   ;;  %v2554_v23 = vmov 1983009808  }
  0x4b   : > { %s2551_s26 = smov 104   ;;  %s2552_s20 = smov 120   ;;  %2148 = vmatpush3.bf16.msra.mxu1 %v2342_v19  ;;  %v828_v24 = vunpack.c.l.s4 %v2554_v23  ;;  %v2555_v28 = vmov 1934713408   ;;  %v831_v31 = vshrl.u32 %v830_v25, 7  ;;  %vm1050_vm3 = vcmask 1043456  }
  0x4c   : > { %s2054_s18 = sshll.u32 %s599_s28, 3  ;;  %s3040_s28 = sld [smem:[#allocation22_spill]]  ;;  %2149 = vmatprep.subr.bf16.mxu1 %v2549_v0  ;;  %v860_v29 = vunpack.c.l.s4 %v2555_v28  ;;  %vm1046_vm4 = vcmask 64512   ;;  %vm1641_vm5 = vcmask 130048   ;;  %vm1643_vm6 = vcmask 195584  }
  0x4d   : > { %s2553_s19 = smov 112   ;;  %v829_v30 = vunpack.c.0.s8 %v828_v24  ;;  %s2559_s22 = smov 24   ;;  %vm1851_vm7 = vcmask 523264  }
  0x4e   : > { %s601_s30 = scalar_lea.vmem %s3038_s23, %s2054_s18  ;;  %v861_v34 = vunpack.c.0.s8 %v860_v29  ;;  %s2558_s18 = smov 8  }
  0x4f   : > { %v2338_v1 = vld [vmem:[%s3039_s2 + $0x8] sm:$0xff]   ;;  %v2339_v2 = vld [vmem:[%s3039_s2] sm:$0xff]   ;;  %2150 = vmatpush3.bf16.msra.mxu1 %v2343_v22  ;;  %v2813_v35 = vsub.s32 %v829_v30, %v831_v31  ;;  %s2100_s24 = sshll.u32 %s2534_s27, 7 }
  0x50   : > { %2140 = vmatpush3.bf16.msra.mxu0 %v2338_v1  ;;  %v2775_v3 = vld [vmem:[%s601_s30] sm:$0xff]  ;;  %2163 = vmatprep.subr.bf16.mxu1 %v2549_v0  ;;  %v2815_v42 = vsub.s32 %v861_v34, %v831_v31 }
  0x51   : > { %2141 = vmatprep.subr.bf16.mxu0 %v2549_v0  ;;  %v608_v5 = vpack.c.bf16 %v2775_v3, %v2775_v3  ;;  %v2059_v22 = vld [vmem:[%s3001_s6] ss:$0 sm:$0xff] }
  0x52   : > { %s3041_s3 = smov %s3040_s28  ;;  %v2340_v4 = vld [vmem:[%s3040_s28 + $0x8] sm:$0xff]   ;;  %s2557_s28 = smov 16  }
  0x53   : > { %v2341_v6 = vld [vmem:[%s3041_s3] sm:$0xff]   ;;  %2152 = vmatmul.mubr.msk.bf16.vlgmr.msra.gmra.mxu1 %vm632_vm1, %v608_v5 }
  0x54   : > { %2142 = vmatpush3.bf16.msra.mxu0 %v2339_v2  ;;  %2165 = vmatprep.mubr.msk.bf16.mxu1 %vm2550_vm0, %v2549_v0 }
  0x55   : > { %2155 = vmatprep.subr.bf16.mxu0 %v2549_v0 }
  0x57   : > { %2144 = vmatmul.mubr.msk.bf16.vlgmr.msra.gmra.mxu0 %vm632_vm1, %v608_v5 }
  0x58   : > { %2156 = vmatpush3.bf16.msra.mxu0 %v2340_v4  ;;  %2159 = vmatprep.mubr.msk.bf16.mxu0 %vm2550_vm0, %v2549_v0 }
  0x59   : > { %2157 = vmatprep.subr.bf16.mxu0 %v2549_v0 }
  0x5c   : > { %2158 = vmatpush3.bf16.msra.mxu0 %v2341_v6 }
  0x5d   : > { %2169 = vmatprep.subr.bf16.mxu0 %v2549_v0 }
  0x5f   : > { %2160 = vmatmul.mubr.msk.bf16.vlgmr.msra.gmra.mxu0 %vm632_vm1, %v608_v5 }
  0x60   : > { %2171 = vmatprep.mubr.msk.bf16.mxu0 %vm2550_vm0, %v2549_v0 }
 0x113   : > { %v733_v23 = vpop.f32.mrf.mxu1 }
 0x114   : > { %v734_v24 = vadd.f32 %v2059_v22, %v733_v23 }
 0x115   : > { %v2153_v25 = vpop.f32.mrf.mxu1 }
 0x117   : > { %v670_v8 = vpop.f32.mrf.mxu0 }
 0x118   : > { %v671_v9 = vadd.f32 %v2055_v7, %v670_v8 }
 0x119   : > { %v2145_v10 = vpop.f32.mrf.mxu0 }
 0x11a   : > { %v739_v11 = vpack.c.bf16 %v671_v9, %v671_v9 }
 0x11b   : > { %v673_v12 = vpop.f32.mrf.mxu0 }
 0x11c   : > { %741 = vst.msk [vmem:[#allocation2] sm:$0xf] %vm740_vm2, %v739_v11  ;;  %v2556_v11 = vmov 0  }
 0x11d   : > { %v2146_v13 = vpop.f32.mrf.mxu0 }
 0x11f   : > { %v809_v14 = vpop.f32.mrf.mxu0 }
 0x120   : > { %v810_v20 = vadd.f32 %v2063_v15, %v809_v14 }
 0x121   : > { %v2161_v16 = vpop.f32.mrf.mxu0 }
 0x123   : > { %v901_v17 = vld [vmem:[#allocation2] sm:$0xf]  ;;  %v812_v18 = vpop.f32.mrf.mxu0 }
 0x124   : > { %909 = vrot.lane.b32.xlu1 %v901_v17, %s2551_s26  ;;  %903 = vrot.lane.b32.xlu0 %v901_v17, %s2552_s20 }
 0x125   : > { %v2162_v21 = vpop.f32.mrf.mxu0 }
 0x128   : > { %906 = vrot.lane.b32.xlu0 %v901_v17, %s2553_s19  ;;  %816 = vrot.lane.b32.xlu1 %v810_v20, %s2552_s20 }
 0x12c   : > { %819 = vrot.lane.b32.xlu0 %v810_v20, %s2553_s19  ;;  %822 = vrot.lane.b32.xlu1 %v810_v20, %s2551_s26 }
 0x14a   : > { %982 = vxpose.xlu0.c.b16.start.end [1/1] (short) (narrow) %v901_v17, 16 }
 0x196   : > { %v910_v26 = vpop.permute.xlu1 %909  ;;  %v904_v27 = vpop.permute.xlu0 %903 }
 0x197   : > { %998 = vxpose.xlu1.c.b16.start.end [1/1] (short) (narrow) %v904_v27, 16  ;;  %v736_v27 = vpop.f32.mrf.mxu1 }
 0x199   : > { %v2154_v28 = vpop.f32.mrf.mxu1 }
 0x19a   : > { %v907_v32 = vpop.permute.xlu0 %906  ;;  %v817_v33 = vpop.permute.xlu1 %816 }
 0x19b   : > { %1014 = vxpose.xlu0.c.b16.start.end [1/1] (short) (narrow) %v907_v32, 16 }
 0x19e   : > { %v820_v36 = vpop.permute.xlu0 %819  ;;  %v823_v37 = vpop.permute.xlu1 %822 }
 0x19f   : > { %v825_v38 = vcombine.low %v810_v20, %v820_v36  ;;  %v826_v39 = vcombine.high %v810_v20, %v820_v36  ;;  %v841_v40 = vcombine.low %v817_v33, %v823_v37  ;;  %v842_v41 = vcombine.high %v817_v33, %v823_v37  ;;  %1030 = vxpose.xlu0.c.b16.start.end [1/1] (short) (narrow) %v910_v26, 16 }
 0x1a0   : > { %v742_v26 = vpack.c.bf16 %v734_v24, %v734_v24 }
 0x1a1   : > { %v833_v43 = vrot.slane %v825_v38, %v2813_v35  ;;  %v840_v44 = vrot.slane %v826_v39, %v2813_v35  ;;  %v849_v45 = vrot.slane %v841_v40, %v2813_v35  ;;  %v856_v46 = vrot.slane %v842_v41, %v2813_v35 }
 0x1a2   : > { %743 = vst.msk [vmem:[#allocation3] sm:$0xf] %vm740_vm2, %v742_v26 }
 0x1a3   : > { %v857_v47 = vcombine.low %v833_v43, %v849_v45  ;;  %v858_v48 = vcombine.high %v833_v43, %v849_v45  ;;  %v873_v49 = vcombine.low %v840_v44, %v856_v46  ;;  %v874_v50 = vcombine.high %v840_v44, %v856_v46 }
 0x1a5   : > { %v865_v51 = vrot.slane %v857_v47, %v2815_v42  ;;  %v872_v52 = vrot.slane %v858_v48, %v2815_v42  ;;  %v881_v53 = vrot.slane %v873_v49, %v2815_v42  ;;  %v888_v54 = vrot.slane %v874_v50, %v2815_v42 }
 0x1a7   : > { %v889_v55 = vcombine.high %v865_v51, %v2549_v0  ;;  %v890_v56 = vcombine.high %v872_v52, %v2549_v0  ;;  %v891_v57 = vcombine.high %v881_v53, %v2549_v0  ;;  %v892_v58 = vcombine.high %v888_v54, %v2549_v0 }
 0x1a8   : > { %v2067_v59 = vpack.c.bf16 %v881_v53, %v865_v51  ;;  %v2068_v60 = vpack.c.bf16 %v888_v54, %v872_v52 }
 0x1a9   : > { %v2069_v61 = vpack.c.bf16 %v891_v57, %v889_v55  ;;  %v2070_v62 = vpack.c.bf16 %v892_v58, %v890_v56  ;;  %v912_v36 = vld [vmem:[#allocation3] sm:$0xf] }
 0x1aa   : > { %v927_v63 = vrot.slane %v2067_v59, %v2813_v35  ;;  %v935_v1 = vrot.slane %v2068_v60, %v2813_v35  ;;  %v1300_v37 = vsel %vm1050_vm3, %v912_v36, 0 }
 0x1ab   : > { %v952_v2 = vrot.slane %v2069_v61, %v2813_v35  ;;  %v960_v4 = vrot.slane %v2070_v62, %v2813_v35 }
 0x1ac   : > { %v936_v5 = vcombine.low %v927_v63, %v935_v1  ;;  %v990_v6 = vpop.trf.xlu0 }
 0x1ad   : > { %v961_v7 = vcombine.low %v952_v2, %v960_v4  ;;  %v1052_v8 = vsel %vm1050_vm3, %v990_v6, 0 }
 0x1ae   : > { %v943_v9 = vrot.slane %v936_v5, %v2815_v42  ;;  %2164 = vmatpush3.bf16.msra.mxu1 %v1052_v8 }
 0x1af   : > { %v968_v10 = vrot.slane %v961_v7, %v2815_v42  ;;  %2175 = vmatprep.subr.bf16.mxu1 %v2549_v0 }
 0x1b0   : > { %v944_v12 = vcombine.high %v943_v9, %v2556_v11  ;;  %v973_v14 = vshrl.u32 %v943_v9, 16 }
 0x1b1   : > { %v972_v13 = vpack.i.b16 %v968_v10, %v943_v9  ;;  %v974_v15 = vshrl.u32 %v968_v10, 16  ;;  %v969_v16 = vcombine.high %v968_v10, %v2556_v11 }
 0x1b2   : > { %v979_v19 = vshrl.u32 %v944_v12, 16 }
 0x1b3   : > { %2166 = vmatmul.mubr.msk.bf16.vlgmr.msra.gmra.mxu1 %vm1046_vm4, %v972_v13  ;;  %v975_v17 = vpack.i.b16 %v974_v15, %v973_v14  ;;  %v978_v18 = vpack.i.b16 %v969_v16, %v944_v12  ;;  %v980_v20 = vshrl.u32 %v969_v16, 16 }
 0x1b4   : > { %2177 = vmatprep.mubr.msk.bf16.mxu1 %vm2550_vm0, %v2549_v0 }
 0x1b5   : > { %v981_v21 = vpack.i.b16 %v980_v20, %v979_v19 }
 0x1f9   : > { %v1006_v29 = vpop.trf.xlu1 }
 0x1fa   : > { %v1098_v30 = vsel %vm1050_vm3, %v1006_v29, 0 }
 0x1fb   : > { %2170 = vmatpush3.bf16.msra.mxu0 %v1098_v30 }
 0x1fc   : > { %2181 = vmatprep.subr.bf16.mxu0 %v2549_v0 }
 0x1fd   : > { %v1022_v31 = vpop.trf.xlu0 }
 0x1fe   : > { %v1144_v32 = vsel %vm1050_vm3, %v1022_v31, 0  ;;  %2172 = vmatmul.mubr.msk.bf16.vlgmr.msra.gmra.mxu0 %vm1046_vm4, %v975_v17 }
 0x1ff   : > { %2176 = vmatpush3.bf16.msra.mxu1 %v1144_v32  ;;  %2183 = vmatprep.mubr.msk.bf16.mxu0 %vm2550_vm0, %v2549_v0 }
 0x200   : > { %2187 = vmatprep.subr.bf16.mxu1 %v2549_v0 }
 0x201   : > { %v1038_v33 = vpop.trf.xlu0 }
 0x202   : > { %v1190_v34 = vsel %vm1050_vm3, %v1038_v33, 0  ;;  %2178 = vmatmul.mubr.msk.bf16.vlgmr.msra.gmra.mxu1 %vm1046_vm4, %v978_v18 }
 0x203   : > { %2182 = vmatpush3.bf16.msra.mxu0 %v1190_v34  ;;  %2189 = vmatprep.mubr.msk.bf16.mxu1 %vm2550_vm0, %v2549_v0 }
 0x204   : > { %2193 = vmatprep.subr.bf16.mxu0 %v2549_v0  ;;  %2188 = vmatpush3.bf16.msra.mxu1 %v1300_v37 }
 0x205   : > { %2199 = vmatprep.subr.bf16.mxu1 %v2549_v0 }
 0x206   : > { %2184 = vmatmul.mubr.msk.bf16.vlgmr.msra.gmra.mxu0 %vm1046_vm4, %v981_v21 }
 0x207   : > { %2195 = vmatprep.mubr.msk.bf16.mxu0 %vm2550_vm0, %v2549_v0 }
 0x273   : > { %v1088_v38 = vpop.f32.mrf.mxu1 }
 0x274   : > { %v1232_v39 = vsel %vm1046_vm4, %v1088_v38, -inf }
 0x275   : > { %1233 = vmax.xlane.f32.xlu1 %v1232_v39  ;;  %v2167_v40 = vpop.f32.mrf.mxu1 }
 0x277   : > { %v1091_v41 = vpop.f32.mrf.mxu1 }
 0x279   : > { %v2168_v43 = vpop.f32.mrf.mxu1 }
 0x286   : > { %914 = vrot.lane.b32.xlu1 %v912_v36, %s2552_s20  ;;  %s1939_s20 = scalar_lea.hbm %s3012_s17, %s2100_s24 }
 0x2be   : > { %v1134_v44 = vpop.f32.mrf.mxu0 }
 0x2bf   : > { %v1235_v45 = vsel %vm1046_vm4, %v1134_v44, -inf }
 0x2c0   : > { %1236 = vmax.xlane.f32.xlu0 %v1235_v45  ;;  %v2173_v46 = vpop.f32.mrf.mxu0 }
 0x2c2   : > { %v1137_v47 = vpop.f32.mrf.mxu0  ;;  %v1180_v48 = vpop.f32.mrf.mxu1 }
 0x2c3   : > { %v1238_v49 = vsel %vm1046_vm4, %v1180_v48, -inf }
 0x2c4   : > { %1239 = vmax.xlane.f32.xlu1 %v1238_v49  ;;  %v2174_v50 = vpop.f32.mrf.mxu0  ;;  %v2179_v51 = vpop.f32.mrf.mxu1 }
 0x2c6   : > { %v1183_v52 = vpop.f32.mrf.mxu1  ;;  %v1226_v53 = vpop.f32.mrf.mxu0 }
 0x2c7   : > { %v1241_v54 = vsel %vm1046_vm4, %v1226_v53, -inf }
 0x2c8   : > { %v2180_v55 = vpop.f32.mrf.mxu1  ;;  %1242 = vmax.xlane.f32.xlu0 %v1241_v54  ;;  %v2185_v56 = vpop.f32.mrf.mxu0 }
 0x2ca   : > { %v1229_v57 = vpop.f32.mrf.mxu0 }
 0x2cc   : > { %v2186_v58 = vpop.f32.mrf.mxu0 }
 0x2d5   : > { %918 = vrot.lane.b32.xlu1 %v912_v36, %s2551_s26 }
 0x2de   : > { %916 = vrot.lane.b32.xlu0 %v912_v36, %s2553_s19  ;;  %s595_s19 = sand.u32 1, %s2526_s25  }
 0x2df   : > { %s2053_s21 = sshll.u32 %s595_s19, 3  ;;  %s1927_s2 = scalar_lea.sflag [#allocation6], %s595_s19 }
 0x2e0   : > { %s597_s23 = scalar_lea.vmem [#allocation10], %s2053_s21 }
 0x2e1   : > { %s1941_s30 = sshll.u32 %s597_s23, 4  ;;  %s1942_s30 = int_to_ptr.vmem [resolvable:$true] %s1941_s30 }
 0x2e2   : > { %s2458_s29 = scalar_lea.vmem %s1942_s30, 128 }
 0x2e3   : > { %p2459_p10 = scmp.ne.s32.totalorder %s1942_s30, %s2458_s29 }
 0x2e5   : > { %p2460_p11 = pnand %p2459_p10, %p2691_p4 }
 0x2e7   : > { %p2461_p13 = pneg %p2460_p11 }
 0x2fe   : > { %v1234_v59 = vpop.xlane.xlu1 %1233 }
 0x2ff   : > { %v1244_v60 = vmax.f32 %v1234_v59, -1e+30 }
 0x301   : > { %v1260_v61 = vsub.f32 %v1088_v38, %v1244_v60  ;;  %v1248_v31 = vsub.f32 -1e+30, %v1244_v60 }
 0x302   : > { %v915_v62 = vpop.permute.xlu1 %914 }
 0x303   : > { %v1264_v63 = vmul.f32 1.442695, %v1260_v61  ;;  %v1346_v1 = vsel %vm1050_vm3, %v915_v62, 0  ;;  %v1252_v32 = vmul.f32 1.442695, %v1248_v31  ;;  %v2344_v31 = vld [vmem:[#allocation7 + $0x8] sm:$0xff]  }
 0x304   : > { %2194 = vmatpush3.bf16.msra.mxu0 %v1346_v1 }
 0x305   : > { %2205 = vmatprep.subr.bf16.mxu0 %v2549_v0  ;;  %2352 = vpow2.f32 %v1264_v63 }
 0x312   : > { %v2353_v2 = vpop.eup %2352 }
 0x313   : > { %v1276_v4 = vsel %vm1046_vm4, %v2353_v2, 0.0  ;;  %v1292_v5 = vpack.c.bf16 %v2353_v2, %v2353_v2 }
 0x314   : > { %1277 = vadd.xlane.f32.xlu1 %v1276_v4 }
 0x315   : > { %2190 = vmatmul.mubr.msk.bf16.vlgmr.msra.gmra.mxu1 %vm1046_vm4, %v1292_v5 }
 0x316   : > { %2201 = vmatprep.mubr.msk.bf16.mxu1 %vm2550_vm0, %v2549_v0 }
 0x349   : > { %v1237_v6 = vpop.xlane.xlu0 %1236 }
 0x34a   : > { %v1245_v7 = vmax.f32 %v1237_v6, -1e+30 }
 0x34c   : > { %v1261_v8 = vsub.f32 %v1134_v44, %v1245_v7  ;;  %v1249_v47 = vsub.f32 -1e+30, %v1245_v7 }
 0x34d   : > { %v1240_v9 = vpop.xlane.xlu1 %1239 }
 0x34e   : > { %v1266_v10 = vmul.f32 1.442695, %v1261_v8  ;;  %v1246_v11 = vmax.f32 %v1240_v9, -1e+30  ;;  %v1254_v50 = vmul.f32 1.442695, %v1249_v47 }
 0x350   : > { %v1262_v12 = vsub.f32 %v1180_v48, %v1246_v11  ;;  %2354 = vpow2.f32 %v1266_v10  ;;  %v1250_v46 = vsub.f32 -1e+30, %v1246_v11 }
 0x351   : > { %v1243_v13 = vpop.xlane.xlu0 %1242  ;;  %v919_v21 = vpop.permute.xlu1 %918 }
 0x352   : > { %v1268_v14 = vmul.f32 1.442695, %v1262_v12  ;;  %v1247_v15 = vmax.f32 %v1243_v13, -1e+30  ;;  %v1438_v24 = vsel %vm1050_vm3, %v919_v21, 0 }
 0x353   : > { %v1256_v48 = vmul.f32 1.442695, %v1250_v46 }
 0x354   : > { %2356 = vpow2.f32 %v1268_v14  ;;  %v1263_v16 = vsub.f32 %v1226_v53, %v1247_v15  ;;  %v1251_v49 = vsub.f32 -1e+30, %v1247_v15 }
 0x355   : > { %v917_v17 = vpop.permute.xlu0 %916 }
 0x356   : > { %v1392_v18 = vsel %vm1050_vm3, %v917_v17, 0  ;;  %v1270_v19 = vmul.f32 1.442695, %v1263_v16  ;;  %v1258_v51 = vmul.f32 1.442695, %v1251_v49 }
 0x357   : > { %2200 = vmatpush3.bf16.msra.mxu1 %v1392_v18 }
 0x358   : > { %2211 = vmatprep.subr.bf16.mxu1 %v2549_v0  ;;  %2358 = vpow2.f32 %v1270_v19 }
 0x359   : > { %2360 = vpow2.f32 %v1252_v32 }
 0x35d   : > { %v2355_v20 = vpop.eup %2354 }
 0x35e   : > { %v1279_v22 = vsel %vm1046_vm4, %v2355_v20, 0.0  ;;  %v1293_v23 = vpack.c.bf16 %v2355_v20, %v2355_v20 }
 0x35f   : > { %1280 = vadd.xlane.f32.xlu0 %v1279_v22 }
 0x360   : > { %2196 = vmatmul.mubr.msk.bf16.vlgmr.msra.gmra.mxu0 %vm1046_vm4, %v1293_v23 }
 0x361   : > { %v2357_v25 = vpop.eup %2356  ;;  %2206 = vmatpush3.bf16.msra.mxu0 %v1438_v24  ;;  %2207 = vmatprep.mubr.msk.bf16.mxu0 %vm2550_vm0, %v2549_v0 }
 0x362   : > { %v1282_v26 = vsel %vm1046_vm4, %v2357_v25, 0.0  ;;  %v1294_v27 = vpack.c.bf16 %v2357_v25, %v2357_v25  ;;  %2219 = vmatprep.subr.bf16.mxu0 %v2549_v0 }
 0x363   : > { %1283 = vadd.xlane.f32.xlu0 %v1282_v26 }
 0x364   : > { %2202 = vmatmul.mubr.msk.bf16.vlgmr.msra.gmra.mxu1 %vm1046_vm4, %v1294_v27 }
 0x365   : > { %2215 = vmatprep.mubr.msk.bf16.mxu1 %vm2550_vm0, %v2549_v0  ;;  %v2359_v28 = vpop.eup %2358  ;;  %2212 = vmatpush3.bf16.msra.mxu1 %v2344_v31 }
 0x366   : > { %v1285_v29 = vsel %vm1046_vm4, %v2359_v28, 0.0  ;;  %v1295_v30 = vpack.c.bf16 %v2359_v28, %v2359_v28  ;;  %v2361_v33 = vpop.eup %2360  ;;  %2213 = vmatprep.subr.bf16.mxu1 %v2549_v0 }
 0x367   : > { %1286 = vadd.xlane.f32.xlu1 %v1285_v29  ;;  %v1272_v36 = vmul.f32 0.0, %v2361_v33 }
 0x368   : > { %2208 = vmatmul.mubr.msk.bf16.vlgmr.msra.gmra.mxu0 %vm1046_vm4, %v1295_v30 }
 0x369   : > { %2223 = vmatprep.mubr.msk.bf16.mxu0 %vm2550_vm0, %v2549_v0 }
 0x39d   : > { %v1278_v34 = vpop.xlane.xlu1 %1277 }
 0x39e   : > { %v1288_v37 = vadd.f32 %v1278_v34, %v1272_v36 }
 0x3a0   : > { %2362 = vrcp.f32 %v1288_v37 }
 0x3a1   : > { %2364 = vpow2.f32 %v1256_v48 }
 0x3a2   : > { %2366 = vpow2.f32 %v1254_v50 }
 0x3a3   : > { %2368 = vpow2.f32 %v1258_v51 }
 0x3ad   : > { %v2363_v40 = vpop.eup %2362 }
 0x3ae   : > { %v2365_v53 = vpop.eup %2364 }
 0x3af   : > { %v1274_v55 = vmul.f32 0.0, %v2365_v53  ;;  %v2367_v56 = vpop.eup %2366 }
 0x3b0   : > { %v2369_v57 = vpop.eup %2368  ;;  %v1273_v59 = vmul.f32 0.0, %v2367_v56 }
 0x3b1   : > { %v1275_v61 = vmul.f32 0.0, %v2369_v57 }
 0x3d5   : > { %v1336_v38 = vpop.f32.mrf.mxu1 }
 0x3d6   : > { %v1480_v39 = vadd.f32 %v1336_v38, %v1272_v36 }
 0x3d7   : > { %v2191_v41 = vpop.f32.mrf.mxu1 }
 0x3d8   : > { %v1488_v43 = vmul.f32 %v2363_v40, %v1480_v39  ;;  %v2345_v41 = vld [vmem:[#allocation7] sm:$0xff]  }
 0x3d9   : > { %v1339_v44 = vpop.f32.mrf.mxu1  ;;  %2214 = vmatpush3.bf16.msra.mxu1 %v2345_v41 }
 0x3da   : > { %2227 = vmatprep.subr.bf16.mxu1 %v2549_v0 }
 0x3db   : > { %v2192_v45 = vpop.f32.mrf.mxu1 }
 0x3e8   : > { %v1281_v52 = vpop.xlane.xlu0 %1280 }
 0x3e9   : > { %v1289_v62 = vadd.f32 %v1281_v52, %v1273_v59 }
 0x3ec   : > { %v1284_v54 = vpop.xlane.xlu0 %1283 }
 0x3ed   : > { %v1290_v58 = vadd.f32 %v1284_v54, %v1274_v55 }
 0x3ef   : > { %2370 = vrcp.f32 %v1290_v58 }
 0x3f0   : > { %v1287_v60 = vpop.xlane.xlu1 %1286  ;;  %2372 = vrcp.f32 %v1289_v62 }
 0x3f1   : > { %v1291_v63 = vadd.f32 %v1287_v60, %v1275_v61 }
 0x3f3   : > { %2374 = vrcp.f32 %v1291_v63 }
 0x3fc   : > { %v2371_v7 = vpop.eup %2370 }
 0x3fd   : > { %v2373_v16 = vpop.eup %2372 }
 0x400   : > { %v2375_v19 = vpop.eup %2374 }
 0x420   : > { %v1382_v1 = vpop.f32.mrf.mxu0 }
 0x421   : > { %v1481_v11 = vadd.f32 %v1382_v1, %v1273_v59 }
 0x422   : > { %v2197_v2 = vpop.f32.mrf.mxu0 }
 0x423   : > { %v1489_v21 = vmul.f32 %v2373_v16, %v1481_v11 }
 0x424   : > { %v1385_v4 = vpop.f32.mrf.mxu0  ;;  %v1428_v5 = vpop.f32.mrf.mxu1 }
 0x425   : > { %v1482_v6 = vadd.f32 %v1428_v5, %v1274_v55 }
 0x426   : > { %v2198_v8 = vpop.f32.mrf.mxu0  ;;  %v2203_v9 = vpop.f32.mrf.mxu1 }
 0x427   : > { %v1490_v10 = vmul.f32 %v2371_v7, %v1482_v6  ;;  %v2081_v6 = vld [vmem:[%s3003_s8] ss:$0 sm:$0xff] }
 0x428   : > { %v1431_v12 = vpop.f32.mrf.mxu1  ;;  %v1474_v15 = vpop.f32.mrf.mxu0 }
 0x429   : > { %v1492_v13 = vcombine.low %v1488_v43, %v1490_v10  ;;  %v1493_v14 = vcombine.high %v1488_v43, %v1490_v10  ;;  %v1483_v17 = vadd.f32 %v1474_v15, %v1275_v61 }
 0x42a   : > { %v2204_v18 = vpop.f32.mrf.mxu1  ;;  %v2209_v20 = vpop.f32.mrf.mxu0 }
 0x42b   : > { %v1491_v22 = vmul.f32 %v2375_v19, %v1483_v17  ;;  %v1500_v27 = vrot.slane %v1492_v13, %v2813_v35  ;;  %v1507_v28 = vrot.slane %v1493_v14, %v2813_v35  ;;  %v2346_v19 = vld [vmem:[#allocation9 + $0x8] sm:$0xff]   ;;  %v2347_v20 = vld [vmem:[#allocation9] sm:$0xff]  }
 0x42c   : > { %v1477_v23 = vpop.f32.mrf.mxu0  ;;  %2220 = vmatpush3.bf16.msra.mxu0 %v2346_v19 }
 0x42d   : > { %v1508_v24 = vcombine.low %v1489_v21, %v1491_v22  ;;  %v1509_v25 = vcombine.high %v1489_v21, %v1491_v22  ;;  %2221 = vmatprep.subr.bf16.mxu0 %v2549_v0  ;;  %v2349_v21 = vld [vmem:[%s3008_s13 + $0x10] sm:$0xff]  }
 0x42e   : > { %v2210_v26 = vpop.f32.mrf.mxu0 }
 0x42f   : > { %v1516_v29 = vrot.slane %v1508_v24, %v2813_v35  ;;  %v1523_v30 = vrot.slane %v1509_v25, %v2813_v35  ;;  %v2085_v26 = vld [vmem:[%s3004_s9] ss:$0 sm:$0xff] }
 0x430   : > { %2222 = vmatpush3.bf16.msra.mxu0 %v2347_v20 }
 0x431   : > { %v1524_v32 = vcombine.low %v1500_v27, %v1516_v29  ;;  %v1525_v33 = vcombine.high %v1500_v27, %v1516_v29  ;;  %v1540_v34 = vcombine.low %v1507_v28, %v1523_v30  ;;  %v1541_v36 = vcombine.high %v1507_v28, %v1523_v30  ;;  %v2086_v28 = vld [vmem:[%s3005_s10] ss:$0 sm:$0xff] }
 0x433   : > { %v1532_v37 = vrot.slane %v1524_v32, %v2815_v42  ;;  %v1539_v38 = vrot.slane %v1525_v33, %v2815_v42  ;;  %v1548_v39 = vrot.slane %v1540_v34, %v2815_v42  ;;  %v1555_v40 = vrot.slane %v1541_v36, %v2815_v42  ;;  %v2350_v32 = vld [vmem:[%s3008_s13 + $0x8] sm:$0xff]   ;;  %v2351_v33 = vld [vmem:[%s3008_s13] sm:$0xff]  }
 0x434   : > { %v2087_v34 = vld [vmem:[%s3007_s12] ss:$0 sm:$0xff] }
 0x435   : > { %v1560_v43 = vcombine.low %v1532_v37, %v1539_v38  ;;  %v2079_v44 = vcombine.high %v1532_v37, %v1539_v38  ;;  %v1576_v45 = vcombine.low %v1548_v39, %v1555_v40  ;;  %v2080_v46 = vcombine.high %v1548_v39, %v1555_v40 }
 0x437   : > { %v1567_v47 = vrot.slane %v1560_v43, %v2813_v35  ;;  %v1575_v48 = vrot.slane %v2079_v44, %v2813_v35  ;;  %v1583_v49 = vrot.slane %v1576_v45, %v2813_v35  ;;  %v1591_v50 = vrot.slane %v2080_v46, %v2813_v35 }
 0x439   : > { %v1593_v51 = vcombine.high %v1567_v47, %v1575_v48  ;;  %v1609_v52 = vcombine.high %v1583_v49, %v1591_v50  ;;  %v1592_v53 = vcombine.low %v1567_v47, %v1575_v48  ;;  %v1608_v54 = vcombine.low %v1583_v49, %v1591_v50 }
 0x43b   : > { %v1607_v55 = vrot.slane %v1593_v51, %v2815_v42  ;;  %v1623_v56 = vrot.slane %v1609_v52, %v2815_v42  ;;  %v1600_v57 = vrot.slane %v1592_v53, %v2815_v42  ;;  %v1616_v58 = vrot.slane %v1608_v54, %v2815_v42 }
 0x43d   : > { %v1626_v59 = vcombine.low %v1607_v55, %v1623_v56  ;;  %v1625_v60 = vcombine.high %v1600_v57, %v1616_v58  ;;  %v1627_v61 = vcombine.high %v1607_v55, %v1623_v56  ;;  %v1624_v62 = vcombine.low %v1600_v57, %v1616_v58 }
 0x43f   : > { %1633 = vrot.lane.b32.xlu1 %v1626_v59, %s2557_s28  ;;  %1629 = vrot.lane.b32.xlu0 %v1625_v60, %s2558_s18  ;;  %v2097_v60 = vld [vmem:[%s3010_s15] ss:$0 sm:$0xff]  ;;  %s2560_s28 = smov [#allocation10]  }
 0x440   : > { %s2462_s18 = sshll.u32 %s2560_s28, 4  ;;  %s2463_s18 = int_to_ptr.vmem [resolvable:$false] %s2462_s18 }
 0x441   : > { %s2464_s27 = scalar_lea.vmem %s2463_s18, 256  ;;  %p2465_p3 = scmp.lt.s32.totalorder %s1942_s30, %s2463_s18 }
 0x442   : > { %p2466_p6 = scmp.lt.s32.totalorder %s2464_s27, %s2458_s29 }
 0x443   : > { %1637 = vrot.lane.b32.xlu1 %v1627_v61, %s2559_s22 }
 0x444   : > { %p2467_p7 = por %p2466_p6, %p2465_p3 }
 0x446   : > { %p2468_p9 = pnand %p2467_p7, %p2461_p13 }
 0x4b1   : > { %v1634_v35 = vpop.permute.xlu1 %1633  ;;  %v1630_v63 = vpop.permute.xlu0 %1629 }
 0x4b2   : > { %v1640_v1 = vsel %vm1046_vm4, %v1624_v62, %v1630_v63  ;;  %v2098_v62 = vld [vmem:[%s3011_s16] ss:$0 sm:$0xff] }
 0x4b3   : > { %v1642_v4 = vsel %vm1641_vm5, %v1640_v1, %v1634_v35 }
 0x4b5   : > { %v1638_v2 = vpop.permute.xlu1 %1637 }
 0x4b6   : > { %v1644_v5 = vsel %vm1643_vm6, %v1642_v4, %v1638_v2 }
 0x4b7   : > { %v1645_v42 = vpack.c.bf16 %v1644_v5, %v1644_v5 }
 0x4b9   : > { %2216 = vmatmul.mubr.msk.bf16.vlgmr.msra.gmra.mxu1 %vm632_vm1, %v1645_v42 }
 0x4ba   : > { %2235 = vmatprep.mubr.msk.bf16.mxu1 %vm2550_vm0, %v2549_v0 }
 0x579   : > { %v1706_v7 = vpop.f32.mrf.mxu1 }
 0x57a   : > { %v1707_v8 = vadd.f32 %v2081_v6, %v1706_v7 }
 0x57b   : > { %v2217_v9 = vpop.f32.mrf.mxu1 }
 0x57c   : > { %v1712_v10 = vadd.f32 %v1707_v8, %v2775_v3  ;;  %v2348_v3 = vld [vmem:[%s3008_s13 + $0x18] sm:$0xff]  }
 0x57d   : > { %v1709_v11 = vpop.f32.mrf.mxu1  ;;  %2228 = vmatpush3.bf16.msra.mxu1 %v2348_v3 }
 0x57e   : > { %v1715_v12 = vsel %vm632_vm1, %v1712_v10, 0.0  ;;  %2229 = vmatprep.subr.bf16.mxu1 %v2549_v0 }
 0x57f   : > { %1716 = vadd.xlane.f32.xlu0 %v1715_v12  ;;  %v2218_v13 = vpop.f32.mrf.mxu1 }
 0x581   : > { %2230 = vmatpush3.bf16.msra.mxu1 %v2349_v21 }
 0x582   : > { %2231 = vmatprep.subr.bf16.mxu1 %v2549_v0 }
 0x585   : > { %2232 = vmatpush3.bf16.msra.mxu1 %v2350_v32 }
 0x586   : > { %2233 = vmatprep.subr.bf16.mxu1 %v2549_v0  ;;  %v2091_v0 = vld [vmem:[%s3009_s14] ss:$0 sm:$0xff] }
 0x589   : > { %2234 = vmatpush3.bf16.msra.mxu1 %v2351_v33 }
 0x608   : > { %v1717_v14 = vpop.xlane.xlu0 %1716 }
 0x609   : > { %v1719_v15 = vmul.f32 0.03125, %v1717_v14 }
 0x60b   : > { %v1720_v16 = vsub.f32 %v1712_v10, %v1719_v15 }
 0x60d   : > { %v1721_v17 = vmul.f32 %v1720_v16, %v1720_v16 }
 0x60f   : > { %v1722_v18 = vsel %vm632_vm1, %v1721_v17, 0.0 }
 0x610   : > { %1723 = vadd.xlane.f32.xlu1 %v1722_v18 }
 0x699   : > { %v1724_v22 = vpop.xlane.xlu1 %1723 }
 0x69a   : > { %v1725_v23 = vmul.f32 0.03125, %v1724_v22 }
 0x69c   : > { %v1726_v24 = vadd.f32 1e-05, %v1725_v23 }
 0x69e   : > { %2376 = vrsqrt.f32 %v1726_v24 }
 0x6ab   : > { %v2377_v25 = vpop.eup %2376 }
 0x6ac   : > { %v1728_v27 = vmul.f32 %v2377_v25, %v1720_v16 }
 0x6ae   : > { %v1735_v29 = vmul.f32 %v2085_v26, %v1728_v27 }
 0x6b0   : > { %v1742_v30 = vadd.f32 %v2086_v28, %v1735_v29 }
 0x6b2   : > { %v1743_v31 = vpack.c.bf16 %v1742_v30, %v1742_v30 }
 0x6b4   : > { %2224 = vmatmul.mubr.msk.bf16.vlgmr.msra.gmra.mxu0 %vm632_vm1, %v1743_v31 }
 0x774   : > { %v1804_v36 = vpop.f32.mrf.mxu0 }
 0x775   : > { %v1805_v37 = vadd.f32 %v2087_v34, %v1804_v36 }
 0x776   : > { %v2225_v38 = vpop.f32.mrf.mxu0 }
 0x777   : > { %v1810_v39 = vmax.f32 %v1805_v37, 0.0 }
 0x778   : > { %v1807_v40 = vpop.f32.mrf.mxu0 }
 0x779   : > { %v1811_v41 = vpack.c.bf16 %v1810_v39, %v1810_v39 }
 0x77a   : > { %v2226_v43 = vpop.f32.mrf.mxu0 }
 0x77b   : > { %2236 = vmatmul.mubr.msk.bf16.vlgmr.msra.gmra.mxu1 %vm1851_vm7, %v1811_v41 }
 0x83b   : > { %v1889_v44 = vpop.f32.mrf.mxu1 }
 0x83c   : > { %v1890_v45 = vadd.f32 %v2091_v0, %v1889_v44 }
 0x83d   : > { %v2237_v46 = vpop.f32.mrf.mxu1 }
 0x83e   : > { %v1895_v47 = vadd.f32 %v1890_v45, %v1742_v30 }
 0x83f   : > { %v1892_v48 = vpop.f32.mrf.mxu1 }
 0x840   : > { %v1898_v49 = vsel %vm632_vm1, %v1895_v47, 0.0 }
 0x841   : > { %1899 = vadd.xlane.f32.xlu0 %v1898_v49  ;;  %v2238_v50 = vpop.f32.mrf.mxu1 }
 0x8ca   : > { %v1900_v51 = vpop.xlane.xlu0 %1899 }
 0x8cb   : > { %v1901_v52 = vmul.f32 0.03125, %v1900_v51 }
 0x8cd   : > { %v1902_v53 = vsub.f32 %v1895_v47, %v1901_v52 }
 0x8cf   : > { %v1903_v54 = vmul.f32 %v1902_v53, %v1902_v53 }
 0x8d1   : > { %v1904_v55 = vsel %vm632_vm1, %v1903_v54, 0.0 }
 0x8d2   : > { %1905 = vadd.xlane.f32.xlu0 %v1904_v55 }
 0x95b   : > { %v1906_v56 = vpop.xlane.xlu0 %1905 }
 0x95c   : > { %v1907_v57 = vmul.f32 0.03125, %v1906_v56 }
 0x95e   : > { %v1908_v58 = vadd.f32 1e-05, %v1907_v57 }
 0x960   : > { %2378 = vrsqrt.f32 %v1908_v58 }
 0x96d   : > { %v2379_v59 = vpop.eup %2378 }
 0x96e   : > { %v1910_v61 = vmul.f32 %v2379_v59, %v1902_v53 }
 0x970   : > { %v1917_v35 = vmul.f32 %v2097_v60, %v1910_v61 }
 0x972   : > { %v1924_v63 = vadd.f32 %v2098_v62, %v1917_v35 }
 0x974   : > { %1925 = vst.msk [vmem:[%s597_s23] sm:$0xff] %vm632_vm1, %v1924_v63 }
 0x975   : > { %2471 = shalt.err (!%p2468_p9)
}
 0x976   : > { %s2472_s21 = scalar_lea.hbm %s1939_s20, 128  ;;  %s2476_s24 = scalar_lea.hbm %s3012_s17, 256 }
 0x977   : > { %p2473_p12 = scmp.ne.s32.totalorder %s1939_s20, %s2472_s21  ;;  %p2477_p2 = scmp.lt.s32.totalorder %s1939_s20, %s3012_s17 }
 0x978   : > { %p2478_p5 = scmp.lt.s32.totalorder %s2476_s24, %s2472_s21 }
 0x979   : > { %p2474_p1 = pnand %p2473_p12, %p2691_p4 }
 0x97a   : > { %p2479_p0 = por %p2478_p5, %p2477_p2 }
 0x97b   : > { %p2475_p8 = pneg %p2474_p1 }
 0x97d   : > { %p2480_p10 = pnand %p2479_p0, %p2475_p8 }
 0x97f   : > { %2483 = shalt.err (!%p2480_p10)
}
 0x980   : > { %2251 = dma.vmem_to_hbm [thread:$0]  (%p2691_p4), %s1942_s30, 128, %s1939_s20, %s1927_s2  }
 0x981 PF: > { %s3042_s26 = sld [smem:[#allocation17_spill]] }
 0x982   : > { %s3043_s29 = sld [smem:[#allocation14_spill]] }
 0x983   : > { %s3044_s28 = sld [smem:[#allocation19_spill]] }
 0x987   : > { %p2273_p11 = scmp.ge.s32.totalorder %s3042_s26, 2 }
 0x988   : > { %s1953_s18 = sand.u32 1, %s3043_s29  }
 0x989   : > { %p3045_p13 = scmp.ne.s32.totalorder %s3044_s28, 0  ;;  %s1954_s27 = scalar_lea.sflag [#allocation6], %s1953_s18 }
 0x98b   : > { %p2264_p3 = pnand %p2273_p11, %p3045_p13 }
 0x98d   : > { %p2265_p6 = pneg %p2264_p3 }
 0x98f   : > { %2517 = dma.done.wait (%p2265_p6), %s1954_s27, 128  }
 0x990   : > { %2519 = vsyncadd (%p2265_p6), %s1954_s27, 4294967168  ;;  %s32_s29 = sadd.s32 1, %s3042_s26   ;;  %s3046_s21 = sld [smem:[#allocation15_spill]] }
 0x991   : > { %p29_p7 = scmp.ge.s32.totalorder %s32_s29, 4   ;;  %s3047_s26 = sld [smem:[#allocation20_spill]] }
 0x992   : > { %s3048_s27 = sld [smem:[#allocation16_spill]]  ;;  %s3050_s24 = smov %s2526_s25 }
 0x993   : > { %s3049_s28 = sld [smem:[#allocation18_spill]]  ;;  %31 = sbr.rel (!%p29_p7) target bundleno = 11 (0xb), region = 141 }
 0x996   : > { %s3051_s25 = smov %s3046_s21 }
 0x998   :  { %1959 = vsyncpa [#allocation5], 1 }
 0x999   :  { %1961 = vsyncpa [#allocation5 + $0x1], 1 }
 0x99a   :  { %1962 = vsyncpa [#allocation8], 1 }
 0x99b   :  { %1963 = vsyncpa [#allocation6], 1 }
 0x99c   :  { %1965 = vsyncpa [#allocation6 + $0x1], 1 }

</bundles_post_ra>
